<compile_context>
chip_gen: v5e
topology: v5e:2x2
jax: 0.10.0
libtpu: 0.0.40
codegen_flags: <defaults>
</compile_context>

<pallas_src>
import jax
import jax.numpy as jnp
from jax import lax
from jax.experimental import pallas as pl
from jax.experimental.pallas import tpu as pltpu

# ---- problem sizes (small, synthetic) ----
N = 32                # batch per call (>= 8 rows; amortizes weight DMA / overhead)
C_IN = 8              # input channels C
H = W = 7             # spatial size entering the aux head
C_MID = 128           # channels after 1x1 conv
C_CONV2 = 768         # channels after 2x2 conv
NUM_CLASSES = 10
PAD_CLASSES = 32      # classifier padded to 32 lanes (was 128; wc rows stay 64 B)
POOL_K, POOL_S = 5, 2
P_OUT = (H - POOL_K) // POOL_S + 1   # = 2
IN_FEATS = C_IN * H * W              # 392
HID1 = P_OUT * P_OUT * C_MID         # 512
BN_EPS = 1e-5


def aux_head_kernel(x_ref, m1_ref, bias_ref, w2_ref, wc_ref, out_ref):
    # x_ref: (Np, C_IN*H*W) f32 — NCHW-contiguous flatten of the input.
    cdt = m1_ref.dtype                                              # matmul operand dtype
    xr = jnp.maximum(x_ref[...], 0.0)                               # ReLU (f32, VPU)

    # fused AvgPool(5,s2) ⊗ Conv1x1 ⊗ BN-scale : one MXU matmul.
    h = jnp.dot(xr.astype(cdt), m1_ref[...],
                preferred_element_type=jnp.float32)                 # (Np, 512)
    h = jnp.maximum(h + bias_ref[:, :HID1], 0.0)                    # BN bias + ReLU

    # Conv2d(128, 768, k=2) over the whole 2x2 map == one matmul.
    h = jnp.dot(h.astype(cdt), w2_ref[...],
                preferred_element_type=jnp.float32)                 # (Np, 768)
    h = jnp.maximum(h, 0.0)                                         # ReLU

    # classifier, padded to PAD_CLASSES lanes (zeros sliced outside).
    out_ref[...] = (jnp.dot(h.astype(cdt), wc_ref[...],
                            preferred_element_type=jnp.float32)
                    + bias_ref[:, HID1:])                           # (Np, 32)


def prepare_params(params, weight_dtype=jnp.bfloat16):
    """One-time weight preprocessing (hoisted out of the per-call path)."""
    w1, bn_gamma, bn_beta, bn_mean, bn_var, w2, wc, bc = params

    inv_std = 1.0 / jnp.sqrt(bn_var + BN_EPS)
    bn_scale = bn_gamma * inv_std                       # (128,)
    bn_bias = bn_beta - bn_mean * bn_scale              # (128,)

    # AvgPool(5, s=2, pad=0) on 7x7 -> 2x2: indicator matrix (H*W, P_OUT*P_OUT);
    # every window is fully interior so the divisor is always 25.
    rows = []
    for h in range(H):
        for w in range(W):
            row = []
            for oh in range(P_OUT):
                for ow in range(P_OUT):
                    inside = (oh * POOL_S <= h < oh * POOL_S + POOL_K and
                              ow * POOL_S <= w < ow * POOL_S + POOL_K)
                    row.append(1.0 / (POOL_K * POOL_K) if inside else 0.0)
            rows.append(row)
    pool_mat = jnp.array(rows, jnp.float32)             # (49, 4)

    # Conv1x1 weight with BN scale folded in: (C_IN, C_MID)
    w1_scaled = w1[:, :, 0, 0].T * bn_scale[None, :]
    # Fused pool ⊗ conv1 ⊗ BN-scale matrix, rows in (c, h, w)-major order so the
    # kernel can consume x_nchw.reshape(N, C*H*W) directly; columns pos-major.
    m1 = jnp.einsum('sp,co->cspo', pool_mat, w1_scaled).reshape(
        IN_FEATS, HID1).astype(weight_dtype)            # (392, 512)

    # Conv2 (O, C, kh, kw) -> (kh, kw, C, O) -> (kh*kw*C, O): matches the
    # pos-major / channel-minor layout of the fused matmul's output.
    w2_mat = jnp.transpose(w2, (2, 3, 1, 0)).reshape(
        HID1, C_CONV2).astype(weight_dtype)             # (512, 768)

    # Classifier padded to 32 output lanes (93%-zero 128-lane pad trimmed).
    wc_pad = jnp.zeros((C_CONV2, PAD_CLASSES), jnp.float32)
    wc_pad = wc_pad.at[:, :NUM_CLASSES].set(wc.T).astype(weight_dtype)
    bc_pad = jnp.zeros((PAD_CLASSES,), jnp.float32).at[:NUM_CLASSES].set(bc)

    # Pack BN bias (tiled over the 4 pool positions) and classifier bias into a
    # single (1, 544) f32 row -> one fewer DMA.
    bias_row = jnp.concatenate(
        [jnp.tile(bn_bias, P_OUT * P_OUT), bc_pad]).reshape(1, HID1 + PAD_CLASSES)

    return (m1, bias_row, w2_mat, wc_pad)


@jax.jit
def aux_head_forward(x_nchw, prepared):
    m1, bias_row, w2_mat, wc_pad = prepared
    n, c, h, w = x_nchw.shape
    assert (c, h, w) == (C_IN, H, W), (
        "AuxiliaryHeadImageNet only type-checks for a 7x7 feature map "
        f"with {C_IN} channels; got {(c, h, w)}")

    x_flat = x_nchw.reshape(n, c * h * w)               # contiguous, no transpose
    n_pad = max(8, ((n + 7) // 8) * 8)                  # full sublane groups
    if n_pad != n:
        x_flat = jnp.pad(x_flat, ((0, n_pad - n), (0, 0)))

    flops = 2 * n_pad * (IN_FEATS * HID1 + HID1 * C_CONV2 + C_CONV2 * PAD_CLASSES)
    bytes_accessed = (
        x_flat.size * x_flat.dtype.itemsize
        + sum(a.size * a.dtype.itemsize for a in (m1, bias_row, w2_mat, wc_pad))
        + n_pad * PAD_CLASSES * 4)

    vmem_specs = [pl.BlockSpec(memory_space=pltpu.MemorySpace.VMEM)
                  for _ in range(5)]
    out_pad = pl.pallas_call(
        aux_head_kernel,
        out_shape=jax.ShapeDtypeStruct((n_pad, PAD_CLASSES), jnp.float32),
        in_specs=vmem_specs,
        out_specs=pl.BlockSpec(memory_space=pltpu.MemorySpace.VMEM),
        cost_estimate=pl.CostEstimate(flops=flops, transcendentals=0,
                                      bytes_accessed=bytes_accessed),
    )(x_flat, m1, bias_row, w2_mat, wc_pad)
    return out_pad[:n, :NUM_CLASSES]


def reference_forward(x_nchw, params):
    """Pure-JAX NCHW f32 reference mirroring the PyTorch module (BN eval mode)."""
    (w1, bn_gamma, bn_beta, bn_mean, bn_var, w2, wc, bc) = params
    hp = lax.Precision.HIGHEST
    x = jnp.maximum(x_nchw, 0.0)
    x = lax.reduce_window(x, 0.0, lax.add, (1, 1, POOL_K, POOL_K),
                          (1, 1, POOL_S, POOL_S), "VALID") / (POOL_K * POOL_K)
    dn = ("NCHW", "OIHW", "NCHW")
    x = lax.conv_general_dilated(x, w1, (1, 1), "VALID",
                                 dimension_numbers=dn, precision=hp)
    x = ((x - bn_mean[None, :, None, None]) / jnp.sqrt(bn_var + BN_EPS)[None, :, None, None]
         * bn_gamma[None, :, None, None] + bn_beta[None, :, None, None])
    x = jnp.maximum(x, 0.0)
    x = lax.conv_general_dilated(x, w2, (1, 1), "VALID",
                                 dimension_numbers=dn, precision=hp)
    x = jnp.maximum(x, 0.0)
    x = x.reshape(x.shape[0], -1)
    return jnp.matmul(x, wc.T, precision=hp) + bc


def fused_reference(x_nchw, prepared_f32):
    """Same fused matrices the kernel uses, evaluated in f32 at HIGHEST precision.

    Validates the offline layout / permutation work (pool⊗conv1⊗BN fusion, w2
    transpose, bias tiling) at tight tolerance, independent of bf16 rounding.
    """
    m1, bias_row, w2_mat, wc_pad = prepared_f32
    hp = lax.Precision.HIGHEST
    xr = jnp.maximum(x_nchw.reshape(x_nchw.shape[0], -1), 0.0)
    h = jnp.maximum(jnp.matmul(xr, m1, precision=hp) + bias_row[:, :HID1], 0.0)
    h = jnp.maximum(jnp.matmul(h, w2_mat, precision=hp), 0.0)
    out = jnp.matmul(h, wc_pad, precision=hp) + bias_row[:, HID1:]
    return out[:, :NUM_CLASSES]


def make_params(key):
    ks = jax.random.split(key, 8)
    w1 = jax.random.normal(ks[0], (C_MID, C_IN, 1, 1), jnp.float32) * 0.1
    bn_gamma = 1.0 + 0.1 * jax.random.normal(ks[1], (C_MID,), jnp.float32)
    bn_beta = 0.1 * jax.random.normal(ks[2], (C_MID,), jnp.float32)
    bn_mean = 0.1 * jax.random.normal(ks[3], (C_MID,), jnp.float32)
    bn_var = 0.5 + jnp.abs(jax.random.normal(ks[4], (C_MID,), jnp.float32)) * 0.2
    w2 = jax.random.normal(ks[5], (C_CONV2, C_MID, 2, 2), jnp.float32) * 0.05
    wc = jax.random.normal(ks[6], (NUM_CLASSES, C_CONV2), jnp.float32) * 0.05
    bc = 0.1 * jax.random.normal(ks[7], (NUM_CLASSES,), jnp.float32)
    return (w1, bn_gamma, bn_beta, bn_mean, bn_var, w2, wc, bc)


if __name__ == "__main__":
    key = jax.random.PRNGKey(0)
    kx, kp = jax.random.split(key)
    x = jax.random.normal(kx, (N, C_IN, H, W), jnp.float32)   # PyTorch NCHW convention
    params = make_params(kp)

    ref = jax.block_until_ready(reference_forward(x, params))

    # --- layout validation: fused f32 matrices vs. unfused reference, tight tol.
    prepared_f32 = jax.block_until_ready(prepare_params(params, jnp.float32))
    fused = jax.block_until_ready(fused_reference(x, prepared_f32))
    assert jnp.allclose(fused, ref, rtol=1e-3, atol=1e-4), (
        "fused-layout mismatch", jnp.max(jnp.abs(fused - ref)))

    # --- production path: weight prep happens exactly once, then the kernel.
    prepared = jax.block_until_ready(prepare_params(params))          # bf16 weights
    out = jax.block_until_ready(aux_head_forward(x, prepared))

    assert out.shape == (N, NUM_CLASSES), out.shape
    # bf16 matmul operands (f32 accumulation) => relaxed tolerance vs f32 reference.
    assert jnp.allclose(out, ref, rtol=2e-2, atol=2e-2), (
        "kernel mismatch", jnp.max(jnp.abs(out - ref)))
    print("KERNEL_OK")
</pallas_src>

<mosaic_0001>
module attributes {stable_mosaic.version = 11 : i64} {
  func.func @aux_head_kernel(%arg0: memref<32x392xf32, #tpu.memory_space<vmem>>, %arg1: memref<392x512xbf16, #tpu.memory_space<vmem>>, %arg2: memref<1x544xf32, #tpu.memory_space<vmem>>, %arg3: memref<512x768xbf16, #tpu.memory_space<vmem>>, %arg4: memref<768x32xbf16, #tpu.memory_space<vmem>>, %arg5: memref<32x32xf32, #tpu.memory_space<vmem>>) attributes {dimension_semantics = [], scalar_prefetch = 0 : i64, scratch_operands = 0 : i64, tpu.core_type = #tpu.core_type<tc>} {
    %c0 = arith.constant 0 : index
    %c0_0 = arith.constant 0 : index
    %0 = vector.load %arg0[%c0, %c0_0] : memref<32x392xf32, #tpu.memory_space<vmem>>, vector<32x392xf32>
    %cst = arith.constant 0.000000e+00 : f32
    %1 = vector.broadcast %cst : f32 to vector<32x392xf32>
    %2 = arith.maximumf %0, %1 : vector<32x392xf32>
    %3 = arith.truncf %2 : vector<32x392xf32> to vector<32x392xbf16>
    %c0_1 = arith.constant 0 : index
    %c0_2 = arith.constant 0 : index
    %4 = vector.load %arg1[%c0_1, %c0_2] : memref<392x512xbf16, #tpu.memory_space<vmem>>, vector<392x512xbf16>
    %cst_3 = arith.constant dense<0.000000e+00> : vector<32x512xf32>
    %5 = tpu.matmul %3, %4, %cst_3 {dimension_numbers = #tpu.dot_dimension_numbers<[1], [0], [0], [1], [0, 0, 1, 1], [], []>} : vector<32x392xbf16>, vector<392x512xbf16>, vector<32x512xf32> -> vector<32x512xf32>
    %c0_4 = arith.constant 0 : index
    %c0_5 = arith.constant 0 : index
    %6 = vector.load %arg2[%c0_4, %c0_5] : memref<1x544xf32, #tpu.memory_space<vmem>>, vector<1x512xf32>
    %7 = vector.broadcast %6 : vector<1x512xf32> to vector<32x512xf32>
    %8 = arith.addf %5, %7 : vector<32x512xf32>
    %cst_6 = arith.constant 0.000000e+00 : f32
    %9 = vector.broadcast %cst_6 : f32 to vector<32x512xf32>
    %10 = arith.maximumf %8, %9 : vector<32x512xf32>
    %11 = arith.truncf %10 : vector<32x512xf32> to vector<32x512xbf16>
    %c0_7 = arith.constant 0 : index
    %c0_8 = arith.constant 0 : index
    %12 = vector.load %arg3[%c0_7, %c0_8] : memref<512x768xbf16, #tpu.memory_space<vmem>>, vector<512x768xbf16>
    %cst_9 = arith.constant dense<0.000000e+00> : vector<32x768xf32>
    %13 = tpu.matmul %11, %12, %cst_9 {dimension_numbers = #tpu.dot_dimension_numbers<[1], [0], [0], [1], [0, 0, 1, 1], [], []>} : vector<32x512xbf16>, vector<512x768xbf16>, vector<32x768xf32> -> vector<32x768xf32>
    %cst_10 = arith.constant 0.000000e+00 : f32
    %14 = vector.broadcast %cst_10 : f32 to vector<32x768xf32>
    %15 = arith.maximumf %13, %14 : vector<32x768xf32>
    %16 = arith.truncf %15 : vector<32x768xf32> to vector<32x768xbf16>
    %c0_11 = arith.constant 0 : index
    %c0_12 = arith.constant 0 : index
    %17 = vector.load %arg4[%c0_11, %c0_12] : memref<768x32xbf16, #tpu.memory_space<vmem>>, vector<768x32xbf16>
    %cst_13 = arith.constant dense<0.000000e+00> : vector<32x32xf32>
    %18 = tpu.matmul %16, %17, %cst_13 {dimension_numbers = #tpu.dot_dimension_numbers<[1], [0], [0], [1], [0, 0, 1, 1], [], []>} : vector<32x768xbf16>, vector<768x32xbf16>, vector<32x32xf32> -> vector<32x32xf32>
    %c0_14 = arith.constant 0 : index
    %c512 = arith.constant 512 : index
    %19 = vector.load %arg2[%c0_14, %c512] : memref<1x544xf32, #tpu.memory_space<vmem>>, vector<1x32xf32>
    %20 = vector.broadcast %19 : vector<1x32xf32> to vector<32x32xf32>
    %21 = arith.addf %18, %20 : vector<32x32xf32>
    %c0_15 = arith.constant 0 : index
    %c0_16 = arith.constant 0 : index
    %22 = vector.load %arg5[%c0_15, %c0_16] : memref<32x32xf32, #tpu.memory_space<vmem>>, vector<32x32xf32>
    tpu.vector_store %arg5[%c0_15, %c0_16], %21 {strides = array<i32>} : memref<32x32xf32, #tpu.memory_space<vmem>>, vector<32x32xf32>,
    return
  }
}

</mosaic_0001>

<bundles_post_ra>
// kernel: aux_head_forward.1
= control target key start
LH: loop header
LB: loop body
LE: loop exit
PB: predicated region body
PF: predicated region fallthrough
CT: control target
= control target key end

     0   :  { %vm666_vm0 = vcmask 1043456   ;;  %vm659_vm1 = vcmask 64512   ;;  %vm3153_vm2 = vcmask 261120   ;;  %s7059_s1 = inlined_call_operand.vmem [shape: bf16[392,512], index: 1, kind: input, shape index: {}]   ;;  %s7060_s0 = inlined_call_operand.vmem [shape: f32[32,392], index: 0, kind: input, shape index: {}]   ;;  %s7061_s2 = inlined_call_operand.vmem [shape: f32[1,544], index: 2, kind: input, shape index: {}]   ;;  %s7062_s3 = inlined_call_operand.vmem [shape: bf16[512,768], index: 3, kind: input, shape index: {}]   ;;  %s7063_s4 = inlined_call_operand.vmem [shape: bf16[768,32], index: 4, kind: input, shape index: {}]   ;;  %s7064_s5 = inlined_call_operand.vmem [shape: f32[32,32], index: 5, kind: output, shape index: {}]  }
   0x1   :  { %v3276_v0 = vld [vmem:[%s7059_s1 + $0xe0] sm:$0xf]  ;;  %v4544_v1 = vld [vmem:[%s7059_s1 + $0xec] sm:$0xf0]  ;;  %v24_v36 = vld [vmem:[%s7060_s0 + $0x18] sm:$0xff] }
   0x2   :  { %v3404_v2 = vld [vmem:[%s7059_s1 + $0x1e0] sm:$0xf]  ;;  %v3277_v3 = vor.u32 %v4544_v1, %v3276_v0  ;;  %v4576_v4 = vld [vmem:[%s7059_s1 + $0x1ec] sm:$0xf0]  ;;  %v28_v37 = vld [vmem:[%s7060_s0 + $0x38] sm:$0xff]  ;;  %v40_v40 = vmax.f32 %v24_v36, 0.0 }
   0x3   :  { %v3532_v5 = vld [vmem:[%s7059_s1 + $0x2e0] sm:$0xf]  ;;  %v4608_v6 = vld [vmem:[%s7059_s1 + $0x2ec] sm:$0xf0]  ;;  %v3405_v7 = vor.u32 %v4576_v4, %v3404_v2  ;;  %v44_v41 = vmax.f32 %v28_v37, 0.0 }
   0x4   :  { %v3533_v8 = vor.u32 %v4608_v6, %v3532_v5  ;;  %v3260_v9 = vld [vmem:[%s7059_s1 + $0xc0] sm:$0xf]  ;;  %v4540_v10 = vld [vmem:[%s7059_s1 + $0xcc] sm:$0xf0]  ;;  %679 = vmatpush.bf16.msra.mxu0 %v3277_v3  ;;  %v4542_v42 = vld [vmem:[%s7059_s1 + $0xe4] sm:$0xf] }
   0x5   :  { %v3388_v11 = vld [vmem:[%s7059_s1 + $0x1c0] sm:$0xf]  ;;  %v3261_v12 = vor.u32 %v4540_v10, %v3260_v9  ;;  %v4572_v13 = vld [vmem:[%s7059_s1 + $0x1cc] sm:$0xf0]  ;;  %698 = vmatpush.bf16.msra.mxu1 %v3405_v7  ;;  %v3278_v43 = vld [vmem:[%s7059_s1 + $0xf0] sm:$0xf0]  ;;  %v4998_v53 = vpack.c.bf16 %v44_v41, %v40_v40 }
   0x6   :  { %v3516_v14 = vld [vmem:[%s7059_s1 + $0x2c0] sm:$0xf]  ;;  %v4604_v15 = vld [vmem:[%s7059_s1 + $0x2cc] sm:$0xf0]  ;;  %717 = vmatpush.bf16.msra.mxu2 %v3533_v8  ;;  %v3389_v16 = vor.u32 %v4572_v13, %v3388_v11  ;;  %v3281_v49 = vor.u32 %v4542_v42, %v3278_v43  ;;  %v4538_v54 = vld [vmem:[%s7059_s1 + $0xc4] sm:$0xf] }
   0x7   :  { %v3517_v17 = vor.u32 %v4604_v15, %v3516_v14  ;;  %v3244_v18 = vld [vmem:[%s7059_s1 + $0xa0] sm:$0xf]  ;;  %v4536_v19 = vld [vmem:[%s7059_s1 + $0xac] sm:$0xf0]  ;;  %v3262_v55 = vld [vmem:[%s7059_s1 + $0xd0] sm:$0xf0] }
   0x8   :  { %v3372_v20 = vld [vmem:[%s7059_s1 + $0x1a0] sm:$0xf]  ;;  %v4568_v21 = vld [vmem:[%s7059_s1 + $0x1ac] sm:$0xf0]  ;;  %680 = vmatpush.bf16.msra.mxu0 %v3261_v12  ;;  %v3245_v24 = vor.u32 %v4536_v19, %v3244_v18  ;;  %v3265_v59 = vor.u32 %v4538_v54, %v3262_v55  ;;  %v4534_v2 = vld [vmem:[%s7059_s1 + $0xa4] sm:$0xf] }
   0x9   :  { %v3500_v22 = vld [vmem:[%s7059_s1 + $0x2a0] sm:$0xf]  ;;  %v4600_v23 = vld [vmem:[%s7059_s1 + $0x2ac] sm:$0xf0]  ;;  %699 = vmatpush.bf16.msra.mxu1 %v3389_v16  ;;  %v3373_v26 = vor.u32 %v4568_v21, %v3372_v20  ;;  %v3246_v3 = vld [vmem:[%s7059_s1 + $0xb0] sm:$0xf0] }
   0xa   :  { %v3228_v25 = vld [vmem:[%s7059_s1 + $0x80] sm:$0xf]  ;;  %718 = vmatpush.bf16.msra.mxu2 %v3517_v17  ;;  %v3501_v27 = vor.u32 %v4600_v23, %v3500_v22  ;;  %v4532_v28 = vld [vmem:[%s7059_s1 + $0x8c] sm:$0xf0]  ;;  %v3249_v7 = vor.u32 %v4534_v2, %v3246_v3  ;;  %v4530_v11 = vld [vmem:[%s7059_s1 + $0x84] sm:$0xf] }
   0xb   :  { %v3356_v29 = vld [vmem:[%s7059_s1 + $0x180] sm:$0xf]  ;;  %v4564_v31 = vld [vmem:[%s7059_s1 + $0x18c] sm:$0xf0]  ;;  %v3229_v38 = vor.u32 %v4532_v28, %v3228_v25  ;;  %v3230_v12 = vld [vmem:[%s7059_s1 + $0x90] sm:$0xf0] }
   0xc   :  { %v4955_v30 = vld [vmem:[%s7059_s1 + $0x300] sm:$0xff]  ;;  %v4596_v33 = vld [vmem:[%s7059_s1 + $0x28c] sm:$0xf0]  ;;  %681 = vmatpush.bf16.msra.mxu0 %v3245_v24  ;;  %v3357_v44 = vor.u32 %v4564_v31, %v3356_v29  ;;  %v3233_v25 = vor.u32 %v4530_v11, %v3230_v12  ;;  %v3406_v43 = vld [vmem:[%s7059_s1 + $0x1f0] sm:$0xf0] }
   0xd   :  { %v3484_v32 = vld [vmem:[%s7059_s1 + $0x280] sm:$0xf]  ;;  %v459_v34 = vunpack.c.l.b16 %v4955_v30  ;;  %700 = vmatpush.bf16.msra.mxu1 %v3373_v26  ;;  %v4528_v46 = vld [vmem:[%s7059_s1 + $0x6c] sm:$0xf0]  ;;  %v460_v17 = vunpack.c.h.b16 %v4955_v30  ;;  %v22_v26 = vld [vmem:[%s7060_s0 + $0x8] sm:$0xff] }
   0xe   :  { %v3212_v35 = vld [vmem:[%s7059_s1 + $0x60] sm:$0xf]  ;;  %719 = vmatpush.bf16.msra.mxu2 %v3501_v27  ;;  %v3485_v45 = vor.u32 %v4596_v33, %v3484_v32  ;;  %v4560_v48 = vld [vmem:[%s7059_s1 + $0x16c] sm:$0xf0]  ;;  %v26_v27 = vld [vmem:[%s7060_s0 + $0x28] sm:$0xff]  ;;  %v38_v40 = vmax.f32 %v22_v26, 0.0 }
   0xf   :  { %v559_v39 = vpack.c.b16 %v459_v34, %v459_v34  ;;  %v3340_v47 = vld [vmem:[%s7059_s1 + $0x160] sm:$0xf]  ;;  %v4592_v52 = vld [vmem:[%s7059_s1 + $0x26c] sm:$0xf0]  ;;  %v3213_v56 = vor.u32 %v4528_v46, %v3212_v35  ;;  %v4526_v32 = vld [vmem:[%s7059_s1 + $0x64] sm:$0xf]  ;;  %v560_v37 = vpack.c.b16 %v460_v17, %v460_v17 }
  0x10   :  { %v3468_v51 = vld [vmem:[%s7059_s1 + $0x260] sm:$0xf]  ;;  %682 = vmatpush.bf16.msra.mxu0 %v3229_v38  ;;  %v4524_v58 = vld [vmem:[%s7059_s1 + $0x4c] sm:$0xf0]  ;;  %v3341_v60 = vor.u32 %v4560_v48, %v3340_v47  ;;  %v3214_v33 = vld [vmem:[%s7059_s1 + $0x70] sm:$0xf0] }
  0x11   :  { %v668_v50 = vsel %vm666_vm0, %v559_v39, 0  ;;  %v3196_v57 = vld [vmem:[%s7059_s1 + $0x40] sm:$0xf]  ;;  %701 = vmatpush.bf16.msra.mxu1 %v3357_v44  ;;  %v3469_v61 = vor.u32 %v4592_v52, %v3468_v51  ;;  %v4556_v63 = vld [vmem:[%s7059_s1 + $0x14c] sm:$0xf0]  ;;  %v32_v38 = vld [vmem:[%s7060_s0 + $0x58] sm:$0xff] }
  0x12   :  { %743 = vmatpush.bf16.msra.mxu3 %v668_v50  ;;  %720 = vmatpush.bf16.msra.mxu2 %v3485_v45  ;;  %v3324_v62 = vld [vmem:[%s7059_s1 + $0x140] sm:$0xf]  ;;  %v4588_v1 = vld [vmem:[%s7059_s1 + $0x24c] sm:$0xf0]  ;;  %v3197_v4 = vor.u32 %v4524_v58, %v3196_v57  ;;  %v36_v39 = vld [vmem:[%s7060_s0 + $0x78] sm:$0xff]  ;;  %v42_v41 = vmax.f32 %v26_v27, 0.0 }
  0x13   :  { %v3452_v0 = vld [vmem:[%s7059_s1 + $0x240] sm:$0xf]  ;;  %v4520_v6 = vld [vmem:[%s7059_s1 + $0x2c] sm:$0xf0]  ;;  %v3325_v8 = vor.u32 %v4556_v63, %v3324_v62  ;;  %v4574_v42 = vld [vmem:[%s7059_s1 + $0x1e4] sm:$0xf] }
  0x14   :  { %683 = vmatpush.bf16.msra.mxu0 %v3213_v56  ;;  %v3180_v5 = vld [vmem:[%s7059_s1 + $0x20] sm:$0xf]  ;;  %v3453_v9 = vor.u32 %v4588_v1, %v3452_v0  ;;  %v4552_v14 = vld [vmem:[%s7059_s1 + $0x12c] sm:$0xf0]  ;;  %v4606_v47 = vld [vmem:[%s7059_s1 + $0x2e4] sm:$0xf]  ;;  %v3409_v56 = vor.u32 %v4574_v42, %v3406_v43  ;;  %v5132_v63 = vpack.c.bf16 %v42_v41, %v38_v40 }
  0x15   :  { %3546 = vmatmul.msk.bf16.vlgmr.msra.gmra.mxu3 %vm659_vm1, %v4998_v53  ;;  %702 = vmatpush.bf16.msra.mxu1 %v3341_v60  ;;  %v3308_v10 = vld [vmem:[%s7059_s1 + $0x120] sm:$0xf]  ;;  %v4584_v16 = vld [vmem:[%s7059_s1 + $0x22c] sm:$0xf0]  ;;  %v3181_v21 = vor.u32 %v4520_v6, %v3180_v5  ;;  %v3534_v48 = vld [vmem:[%s7059_s1 + $0x2f0] sm:$0xf0] }
  0x16   :  { %755 = vmatpush.bf16.msrb.mxu3 %v3281_v49  ;;  %721 = vmatpush.bf16.msra.mxu2 %v3469_v61  ;;  %v21_v13 = vld [vmem:[%s7060_s0] sm:$0xff]  ;;  %v4516_v19 = vld [vmem:[%s7059_s1 + $0xc] sm:$0xf0]  ;;  %v3309_v29 = vor.u32 %v4552_v14, %v3308_v10  ;;  %v3217_v49 = vor.u32 %v4526_v32, %v3214_v33  ;;  %v48_v52 = vmax.f32 %v32_v38, 0.0  ;;  %v52_v54 = vmax.f32 %v36_v39, 0.0 }
  0x17   :  { %v3436_v15 = vld [vmem:[%s7059_s1 + $0x220] sm:$0xf]  ;;  %v4548_v23 = vld [vmem:[%s7059_s1 + $0x10c] sm:$0xf0]  ;;  %v37_v35 = vmax.f32 %v21_v13, 0.0  ;;  %v671_v55 = vsel %vm666_vm0, %v560_v37, 0 }
  0x18   :  { %v3164_v18 = vld [vmem:[%s7059_s1] sm:$0xf]  ;;  %684 = vmatpush.bf16.msra.mxu0 %v3197_v4  ;;  %v23_v28 = vld [vmem:[%s7060_s0 + $0x10] sm:$0xff]  ;;  %v3437_v30 = vor.u32 %v4584_v16, %v3436_v15  ;;  %v4570_v57 = vld [vmem:[%s7059_s1 + $0x1c4] sm:$0xf]  ;;  %v5142_v3 = vpack.c.bf16 %v52_v54, %v48_v52 }
  0x19   :  { %v25_v20 = vld [vmem:[%s7060_s0 + $0x20] sm:$0xff]  ;;  %703 = vmatpush.bf16.msra.mxu1 %v3325_v8  ;;  %v27_v31 = vld [vmem:[%s7060_s0 + $0x30] sm:$0xff]  ;;  %v3165_v44 = vor.u32 %v4516_v19, %v3164_v18  ;;  %v39_v45 = vmax.f32 %v23_v28, 0.0  ;;  %v3284_v26 = vld [vmem:[%s7059_s1 + $0xe8] sm:$0xf] }
  0x1a   :  { %756 = vmatpush.bf16.msrb.mxu3 %v3265_v59  ;;  %v3292_v22 = vld [vmem:[%s7059_s1 + $0x100] sm:$0xf]  ;;  %722 = vmatpush.bf16.msra.mxu2 %v3453_v9  ;;  %v4580_v34 = vld [vmem:[%s7059_s1 + $0x20c] sm:$0xf0]  ;;  %v41_v36 = vmax.f32 %v25_v20, 0.0  ;;  %v43_v46 = vmax.f32 %v27_v31, 0.0  ;;  %v3537_v59 = vor.u32 %v4606_v47, %v3534_v48 }
  0x1b   :  { %v3420_v24 = vld [vmem:[%s7059_s1 + $0x200] sm:$0xf]  ;;  %v3293_v50 = vor.u32 %v4548_v23, %v3292_v22  ;;  %v3390_v60 = vld [vmem:[%s7059_s1 + $0x1d0] sm:$0xf0]  ;;  %v4522_v61 = vld [vmem:[%s7059_s1 + $0x44] sm:$0xf] }
  0x1c   :  { %685 = vmatpush.bf16.msra.mxu0 %v3181_v21  ;;  %v3421_v51 = vor.u32 %v4580_v34, %v3420_v24  ;;  %v5121_v58 = vpack.c.bf16 %v41_v36, %v37_v35  ;;  %v3198_v62 = vld [vmem:[%s7059_s1 + $0x50] sm:$0xf0]  ;;  %v5134_v0 = vpack.c.bf16 %v43_v46, %v39_v45  ;;  %v4602_v1 = vld [vmem:[%s7059_s1 + $0x2c4] sm:$0xf]  ;;  %v3393_v4 = vor.u32 %v4570_v57, %v3390_v60  ;;  %v30_v24 = vld [vmem:[%s7060_s0 + $0x48] sm:$0xff] }
  0x1d   :  { %704 = vmatpush.bf16.msra.mxu1 %v3309_v29  ;;  %v3518_v2 = vld [vmem:[%s7059_s1 + $0x2d0] sm:$0xf0]  ;;  %v3201_v5 = vor.u32 %v4522_v61, %v3198_v62  ;;  %v4566_v6 = vld [vmem:[%s7059_s1 + $0x1a4] sm:$0xf]  ;;  %v4545_v27 = vld [vmem:[%s7059_s1 + $0xf4] sm:$0xf0] }
  0x1e   :  { %757 = vmatpush.bf16.msrb.mxu3 %v3249_v7  ;;  %723 = vmatpush.bf16.msra.mxu2 %v3437_v30  ;;  %v3521_v7 = vor.u32 %v4602_v1, %v3518_v2  ;;  %v3374_v8 = vld [vmem:[%s7059_s1 + $0x1b0] sm:$0xf0]  ;;  %v4518_v9 = vld [vmem:[%s7059_s1 + $0x24] sm:$0xf]  ;;  %v5212_v35 = vld [vmem:[%s7059_s1 + $0x308] sm:$0xff]  ;;  %v46_v36 = vmax.f32 %v30_v24, 0.0  ;;  %v3285_v40 = vor.u32 %v4545_v27, %v3284_v26 }
  0x1f   :  { %v3182_v10 = vld [vmem:[%s7059_s1 + $0x30] sm:$0xf0]  ;;  %v4598_v11 = vld [vmem:[%s7059_s1 + $0x2a4] sm:$0xf]  ;;  %v3377_v16 = vor.u32 %v4566_v6, %v3374_v8  ;;  %v461_v41 = vunpack.c.l.b16 %v5212_v35  ;;  %v3268_v52 = vld [vmem:[%s7059_s1 + $0xc8] sm:$0xf] }
  0x20   :  { %686 = vmatpush.bf16.msra.mxu0 %v3165_v44  ;;  %v3502_v12 = vld [vmem:[%s7059_s1 + $0x2b0] sm:$0xf0]  ;;  %v4562_v13 = vld [vmem:[%s7059_s1 + $0x184] sm:$0xf]  ;;  %v3185_v17 = vor.u32 %v4518_v9, %v3182_v10  ;;  %v4541_v54 = vld [vmem:[%s7059_s1 + $0xd4] sm:$0xf0] }
  0x21   :  { %705 = vmatpush.bf16.msra.mxu1 %v3293_v50  ;;  %v3358_v14 = vld [vmem:[%s7059_s1 + $0x190] sm:$0xf0]  ;;  %v29_v15 = vld [vmem:[%s7060_s0 + $0x40] sm:$0xff]  ;;  %v3505_v21 = vor.u32 %v4598_v11, %v3502_v12  ;;  %v561_v46 = vpack.c.b16 %v461_v41, %v461_v41  ;;  %v3269_v62 = vor.u32 %v4541_v54, %v3268_v52  ;;  %v4537_v6 = vld [vmem:[%s7059_s1 + $0xb4] sm:$0xf0] }
  0x22   :  { %758 = vmatpush.bf16.msrb.mxu3 %v3233_v25  ;;  %724 = vmatpush.bf16.msra.mxu2 %v3421_v51  ;;  %v4594_v18 = vld [vmem:[%s7059_s1 + $0x284] sm:$0xf]  ;;  %v3486_v19 = vld [vmem:[%s7059_s1 + $0x290] sm:$0xf0]  ;;  %v34_v25 = vld [vmem:[%s7060_s0 + $0x68] sm:$0xff]  ;;  %v3361_v28 = vor.u32 %v4562_v13, %v3358_v14  ;;  %v45_v33 = vmax.f32 %v29_v15, 0.0 }
  0x23   :  { %687 = vmatmul.bf16.vlgmr.msra.gmra.mxu0 %v5121_v58  ;;  %v4514_v20 = vld [vmem:[%s7059_s1 + $0x4] sm:$0xf]  ;;  %v3166_v22 = vld [vmem:[%s7059_s1 + $0x10] sm:$0xf0]  ;;  %v3489_v31 = vor.u32 %v4594_v18, %v3486_v19  ;;  %v50_v37 = vmax.f32 %v34_v25, 0.0 }
  0x24   :  { %774 = vmatpush.bf16.msrb.mxu0 %v3409_v56  ;;  %706 = vmatmul.bf16.vlgmr.msra.gmra.mxu1 %v5132_v63  ;;  %v33_v23 = vld [vmem:[%s7060_s0 + $0x60] sm:$0xff]  ;;  %v31_v29 = vld [vmem:[%s7060_s0 + $0x50] sm:$0xff]  ;;  %v3169_v32 = vor.u32 %v4514_v20, %v3166_v22  ;;  %v3412_v18 = vld [vmem:[%s7059_s1 + $0x1e8] sm:$0xf] }
  0x25   :  { %793 = vmatpush.bf16.msrb.mxu1 %v3537_v59  ;;  %725 = vmatmul.bf16.vlgmr.msra.gmra.mxu2 %v5134_v0  ;;  %v35_v30 = vld [vmem:[%s7060_s0 + $0x70] sm:$0xff]  ;;  %v49_v34 = vmax.f32 %v33_v23, 0.0  ;;  %v4558_v38 = vld [vmem:[%s7059_s1 + $0x164] sm:$0xf]  ;;  %v47_v42 = vmax.f32 %v31_v29, 0.0  ;;  %v5242_v56 = vpack.c.bf16 %v50_v37, %v46_v36 }
  0x26   :  { %759 = vmatpush.bf16.msrb.mxu3 %v3217_v49  ;;  %819 = vmatpush.bf16.msrb.mxu2 %v671_v55  ;;  %v3342_v39 = vld [vmem:[%s7059_s1 + $0x170] sm:$0xf0]  ;;  %v51_v43 = vmax.f32 %v35_v30, 0.0  ;;  %v4590_v44 = vld [vmem:[%s7059_s1 + $0x264] sm:$0xf]  ;;  %v674_v55 = vsel %vm666_vm0, %v561_v46, 0  ;;  %v462_v46 = vunpack.c.h.b16 %v5212_v35 }
  0x27   :  { %3547 = vmatmul.msk.bf16.gmra.mxu3 %vm659_vm1, %v5142_v3  ;;  %v3470_v45 = vld [vmem:[%s7059_s1 + $0x270] sm:$0xf0]  ;;  %v3345_v47 = vor.u32 %v4558_v38, %v3342_v39  ;;  %v4554_v48 = vld [vmem:[%s7059_s1 + $0x144] sm:$0xf]  ;;  %v5233_v50 = vpack.c.bf16 %v49_v34, %v45_v33  ;;  %v4577_v19 = vld [vmem:[%s7059_s1 + $0x1f4] sm:$0xf0] }
  0x28   :  { %775 = vmatpush.bf16.msrb.mxu0 %v3393_v4  ;;  %v3326_v49 = vld [vmem:[%s7059_s1 + $0x150] sm:$0xf0]  ;;  %v3473_v51 = vor.u32 %v4590_v44, %v3470_v45  ;;  %v5244_v57 = vpack.c.bf16 %v51_v43, %v47_v42  ;;  %v4586_v59 = vld [vmem:[%s7059_s1 + $0x244] sm:$0xf]  ;;  %v3540_v20 = vld [vmem:[%s7059_s1 + $0x2e8] sm:$0xf]  ;;  %v3413_v25 = vor.u32 %v4577_v19, %v3412_v18  ;;  %v562_v54 = vpack.c.b16 %v462_v46, %v462_v46 }
  0x29   :  { %794 = vmatpush.bf16.msrb.mxu1 %v3521_v7  ;;  %v3454_v60 = vld [vmem:[%s7059_s1 + $0x250] sm:$0xf0]  ;;  %v3329_v61 = vor.u32 %v4554_v48, %v3326_v49  ;;  %v4550_v1 = vld [vmem:[%s7059_s1 + $0x124] sm:$0xf]  ;;  %v3220_v26 = vld [vmem:[%s7059_s1 + $0x68] sm:$0xf] }
  0x2a   :  { %760 = vmatpush.bf16.msrb.mxu3 %v3201_v5  ;;  %895 = vmatpush.bf16.msra.mxu2 %v674_v55  ;;  %v3457_v2 = vor.u32 %v4586_v59, %v3454_v60  ;;  %v3310_v4 = vld [vmem:[%s7059_s1 + $0x130] sm:$0xf0]  ;;  %v3252_v5 = vld [vmem:[%s7059_s1 + $0xa8] sm:$0xf]  ;;  %v4582_v7 = vld [vmem:[%s7059_s1 + $0x224] sm:$0xf] }
  0x2b   :  { %v3438_v8 = vld [vmem:[%s7059_s1 + $0x230] sm:$0xf0]  ;;  %v3313_v9 = vor.u32 %v4550_v1, %v3310_v4  ;;  %v3253_v10 = vor.u32 %v4537_v6, %v3252_v5  ;;  %v4546_v11 = vld [vmem:[%s7059_s1 + $0x104] sm:$0xf]  ;;  %v4529_v27 = vld [vmem:[%s7059_s1 + $0x74] sm:$0xf0] }
  0x2c   :  { %776 = vmatpush.bf16.msrb.mxu0 %v3377_v16  ;;  %v3294_v12 = vld [vmem:[%s7059_s1 + $0x110] sm:$0xf0]  ;;  %v4578_v13 = vld [vmem:[%s7059_s1 + $0x204] sm:$0xf]  ;;  %v3441_v14 = vor.u32 %v4582_v7, %v3438_v8  ;;  %v3236_v16 = vld [vmem:[%s7059_s1 + $0x88] sm:$0xf]  ;;  %v3221_v29 = vor.u32 %v4529_v27, %v3220_v26 }
  0x2d   :  { %795 = vmatpush.bf16.msrb.mxu1 %v3505_v21  ;;  %v3422_v15 = vld [vmem:[%s7059_s1 + $0x210] sm:$0xf0]  ;;  %v4609_v21 = vld [vmem:[%s7059_s1 + $0x2f4] sm:$0xf0]  ;;  %v3297_v22 = vor.u32 %v4546_v11, %v3294_v12  ;;  %v3396_v30 = vld [vmem:[%s7059_s1 + $0x1c8] sm:$0xf] }
  0x2e   :  { %761 = vmatpush.bf16.msrb.mxu3 %v3185_v17  ;;  %v4533_v17 = vld [vmem:[%s7059_s1 + $0x94] sm:$0xf0]  ;;  %v3425_v24 = vor.u32 %v4578_v13, %v3422_v15  ;;  %v3204_v34 = vld [vmem:[%s7059_s1 + $0x48] sm:$0xf]  ;;  %v677_v1 = vsel %vm666_vm0, %v562_v54, 0 }
  0x2f   :  { %v3237_v23 = vor.u32 %v4533_v17, %v3236_v16  ;;  %v4605_v33 = vld [vmem:[%s7059_s1 + $0x2d4] sm:$0xf0]  ;;  %v3508_v42 = vld [vmem:[%s7059_s1 + $0x2a8] sm:$0xf]  ;;  %v4539_v11 = vld [vmem:[%s7059_s1 + $0xcc] sm:$0xf] }
  0x30   :  { %777 = vmatpush.bf16.msrb.mxu0 %v3361_v28  ;;  %v3541_v28 = vor.u32 %v4609_v21, %v3540_v20  ;;  %v4525_v36 = vld [vmem:[%s7059_s1 + $0x54] sm:$0xf0]  ;;  %v3188_v44 = vld [vmem:[%s7059_s1 + $0x28] sm:$0xf]  ;;  %v3270_v12 = vld [vmem:[%s7059_s1 + $0xd8] sm:$0xf0] }
  0x31   :  { %796 = vmatpush.bf16.msrb.mxu1 %v3489_v31  ;;  %v4573_v31 = vld [vmem:[%s7059_s1 + $0x1d4] sm:$0xf0]  ;;  %v3205_v39 = vor.u32 %v4525_v36, %v3204_v34  ;;  %v3492_v35 = vld [vmem:[%s7059_s1 + $0x288] sm:$0xf]  ;;  %v3273_v19 = vor.u32 %v4539_v11, %v3270_v12  ;;  %v4535_v20 = vld [vmem:[%s7059_s1 + $0xac] sm:$0xf] }
  0x32   :  { %762 = vmatpush.bf16.msrb.mxu3 %v3169_v32  ;;  %v3524_v32 = vld [vmem:[%s7059_s1 + $0x2c8] sm:$0xf]  ;;  %v3397_v37 = vor.u32 %v4573_v31, %v3396_v30  ;;  %v4569_v41 = vld [vmem:[%s7059_s1 + $0x1b4] sm:$0xf0]  ;;  %v3254_v21 = vld [vmem:[%s7059_s1 + $0xb8] sm:$0xf0] }
  0x33   :  { %692 = vmatmul.bf16.gmra.mxu0 %v5233_v50  ;;  %v3525_v38 = vor.u32 %v4605_v33, %v3524_v32  ;;  %v4601_v43 = vld [vmem:[%s7059_s1 + $0x2b4] sm:$0xf0]  ;;  %v3172_v59 = vld [vmem:[%s7059_s1 + $0x8] sm:$0xf]  ;;  %v3238_v30 = vld [vmem:[%s7059_s1 + $0x98] sm:$0xf0] }
  0x34   :  { %778 = vmatpush.bf16.msrb.mxu0 %v3345_v47  ;;  %711 = vmatmul.bf16.gmra.mxu1 %v5242_v56  ;;  %v4521_v45 = vld [vmem:[%s7059_s1 + $0x34] sm:$0xf0]  ;;  %v3509_v48 = vor.u32 %v4601_v43, %v3508_v42  ;;  %v3348_v6 = vld [vmem:[%s7059_s1 + $0x168] sm:$0xf]  ;;  %v3542_v42 = vld [vmem:[%s7059_s1 + $0x2f8] sm:$0xf0] }
  0x35   :  { %797 = vmatpush.bf16.msrb.mxu1 %v3473_v51  ;;  %730 = vmatmul.bf16.gmra.mxu2 %v5244_v57  ;;  %v3189_v49 = vor.u32 %v4521_v45, %v3188_v44  ;;  %v3364_v51 = vld [vmem:[%s7059_s1 + $0x188] sm:$0xf]  ;;  %v4565_v52 = vld [vmem:[%s7059_s1 + $0x194] sm:$0xf0]  ;;  %v4527_v43 = vld [vmem:[%s7059_s1 + $0x6c] sm:$0xf] }
  0x36   :  { %831 = vmatpush.bf16.msra.mxu3 %v3285_v40  ;;  %v3380_v40 = vld [vmem:[%s7059_s1 + $0x1a8] sm:$0xf]  ;;  %v4597_v55 = vld [vmem:[%s7059_s1 + $0x294] sm:$0xf0]  ;;  %v3222_v44 = vld [vmem:[%s7059_s1 + $0x78] sm:$0xf0] }
  0x37   :  { %763 = vmatmul.bf16.vlgmr.msrb.gmra.mxu3 %v5121_v58  ;;  %v3381_v47 = vor.u32 %v4569_v41, %v3380_v40  ;;  %v4517_v60 = vld [vmem:[%s7059_s1 + $0x14] sm:$0xf0]  ;;  %v3493_v4 = vor.u32 %v4597_v55, %v3492_v35  ;;  %v3476_v8 = vld [vmem:[%s7059_s1 + $0x268] sm:$0xf]  ;;  %v3414_v40 = vld [vmem:[%s7059_s1 + $0x1f8] sm:$0xf0] }
  0x38   :  { %779 = vmatpush.bf16.msrb.mxu0 %v3329_v61  ;;  %v4543_v61 = vld [vmem:[%s7059_s1 + $0xec] sm:$0xf]  ;;  %v3173_v5 = vor.u32 %v4517_v60, %v3172_v59  ;;  %v4561_v7 = vld [vmem:[%s7059_s1 + $0x174] sm:$0xf0]  ;;  %v3332_v15 = vld [vmem:[%s7059_s1 + $0x148] sm:$0xf] }
  0x39   :  { %798 = vmatpush.bf16.msrb.mxu1 %v3457_v2  ;;  %v3365_v2 = vor.u32 %v4565_v52, %v3364_v51  ;;  %v3349_v13 = vor.u32 %v4561_v7, %v3348_v6  ;;  %v4557_v16 = vld [vmem:[%s7059_s1 + $0x154] sm:$0xf0]  ;;  %v3460_v17 = vld [vmem:[%s7059_s1 + $0x248] sm:$0xf]  ;;  %v4607_v41 = vld [vmem:[%s7059_s1 + $0x2ec] sm:$0xf] }
  0x3a   :  { %832 = vmatpush.bf16.msra.mxu3 %v3269_v62  ;;  %v3286_v62 = vld [vmem:[%s7059_s1 + $0xf8] sm:$0xf0]  ;;  %v4589_v18 = vld [vmem:[%s7059_s1 + $0x254] sm:$0xf0]  ;;  %v3444_v26 = vld [vmem:[%s7059_s1 + $0x228] sm:$0xf] }
  0x3b   :  { %v4585_v27 = vld [vmem:[%s7059_s1 + $0x234] sm:$0xf0]  ;;  %v3300_v32 = vld [vmem:[%s7059_s1 + $0x108] sm:$0xf]  ;;  %v4571_v51 = vld [vmem:[%s7059_s1 + $0x1cc] sm:$0xf] }
  0x3c   :  { %780 = vmatpush.bf16.msrb.mxu0 %v3313_v9  ;;  %v4593_v9 = vld [vmem:[%s7059_s1 + $0x274] sm:$0xf0]  ;;  %v3445_v33 = vor.u32 %v4585_v27, %v3444_v26  ;;  %v3428_v36 = vld [vmem:[%s7059_s1 + $0x208] sm:$0xf]  ;;  %v3398_v52 = vld [vmem:[%s7059_s1 + $0x1d8] sm:$0xf0] }
  0x3d   :  { %799 = vmatpush.bf16.msrb.mxu1 %v3441_v14  ;;  %v3477_v14 = vor.u32 %v4593_v9, %v3476_v8  ;;  %v4549_v34 = vld [vmem:[%s7059_s1 + $0x114] sm:$0xf0]  ;;  %v4603_v35 = vld [vmem:[%s7059_s1 + $0x2cc] sm:$0xf]  ;;  %v3526_v54 = vld [vmem:[%s7059_s1 + $0x2d8] sm:$0xf0]  ;;  %v3401_v55 = vor.u32 %v4571_v51, %v3398_v52 }
  0x3e   :  { %833 = vmatpush.bf16.msra.mxu3 %v3253_v10  ;;  %v3289_v10 = vor.u32 %v4543_v61, %v3286_v62  ;;  %v3301_v45 = vor.u32 %v4549_v34, %v3300_v32  ;;  %v4523_v59 = vld [vmem:[%s7059_s1 + $0x4c] sm:$0xf]  ;;  %v3529_v60 = vor.u32 %v4603_v35, %v3526_v54  ;;  %v3206_v61 = vld [vmem:[%s7059_s1 + $0x58] sm:$0xf0]  ;;  %v3676_v51 = vld [vmem:[%s7062_s3 + $0xf0] sm:$0xf] }
  0x3f   :  { %v4567_v62 = vld [vmem:[%s7059_s1 + $0x1ac] sm:$0xf]  ;;  %v3190_v9 = vld [vmem:[%s7059_s1 + $0x38] sm:$0xf0]  ;;  %v4643_v52 = vld [vmem:[%s7062_s3 + $0x104] sm:$0xf0] }
  0x40   :  { %781 = vmatpush.bf16.msrb.mxu0 %v3297_v22  ;;  %v3333_v22 = vor.u32 %v4557_v16, %v3332_v15  ;;  %v4519_v7 = vld [vmem:[%s7059_s1 + $0x2c] sm:$0xf]  ;;  %v3366_v11 = vld [vmem:[%s7059_s1 + $0x198] sm:$0xf0]  ;;  %v3677_v35 = vor.u32 %v4643_v52, %v3676_v51  ;;  %v3652_v54 = vld [vmem:[%s7062_s3 + $0xc0] sm:$0xf] }
  0x41   :  { %800 = vmatpush.bf16.msrb.mxu1 %v3425_v24  ;;  %v3316_v24 = vld [vmem:[%s7059_s1 + $0x128] sm:$0xf]  ;;  %v4595_v12 = vld [vmem:[%s7059_s1 + $0x28c] sm:$0xf]  ;;  %v3334_v27 = vld [vmem:[%s7059_s1 + $0x158] sm:$0xf0] }
  0x42   :  { %834 = vmatpush.bf16.msra.mxu3 %v3237_v23  ;;  %v3461_v23 = vor.u32 %v4589_v18, %v3460_v17  ;;  %v4515_v16 = vld [vmem:[%s7059_s1 + $0xc] sm:$0xf]  ;;  %v3174_v18 = vld [vmem:[%s7059_s1 + $0x18] sm:$0xf0]  ;;  %v4622_v51 = vld [vmem:[%s7062_s3 + $0x64] sm:$0xf] }
  0x43   :  { %782 = vmatmul.bf16.vlgmr.msrb.gmra.mxu0 %v5132_v63  ;;  %v4555_v26 = vld [vmem:[%s7059_s1 + $0x14c] sm:$0xf]  ;;  %v3606_v52 = vld [vmem:[%s7062_s3 + $0x78] sm:$0xf0] }
  0x44   :  { %850 = vmatpush.bf16.msra.mxu0 %v3413_v25  ;;  %801 = vmatmul.bf16.vlgmr.msrb.gmra.mxu1 %v5134_v0  ;;  %v4553_v25 = vld [vmem:[%s7059_s1 + $0x134] sm:$0xf0]  ;;  %v4551_v32 = vld [vmem:[%s7059_s1 + $0x12c] sm:$0xf] }
  0x45   :  { %869 = vmatpush.bf16.msra.mxu1 %v3541_v28  ;;  %3548 = vmatmul.msk.bf16.vlgmr.msrb.gmra.mxu2 %vm659_vm1, %v4998_v53  ;;  %v3257_v28 = vor.u32 %v4535_v20, %v3254_v21  ;;  %v3317_v31 = vor.u32 %v4553_v25, %v3316_v24  ;;  %v3350_v20 = vld [vmem:[%s7059_s1 + $0x178] sm:$0xf0]  ;;  %v4591_v21 = vld [vmem:[%s7059_s1 + $0x26c] sm:$0xf] }
  0x46   :  { %835 = vmatpush.bf16.msra.mxu3 %v3221_v29  ;;  %971 = vmatpush.bf16.msrb.mxu2 %v677_v1  ;;  %v4531_v29 = vld [vmem:[%s7059_s1 + $0x8c] sm:$0xf]  ;;  %v3382_v1 = vld [vmem:[%s7059_s1 + $0x1b8] sm:$0xf0] }
  0x47   :  { %768 = vmatmul.bf16.gmra.mxu3 %v5233_v50  ;;  %v3385_v6 = vor.u32 %v4567_v62, %v3382_v1  ;;  %v4583_v34 = vld [vmem:[%s7059_s1 + $0x22c] sm:$0xf]  ;;  %v4619_v1 = vld [vmem:[%s7062_s3 + $0x44] sm:$0xf0] }
  0x48   :  { %851 = vmatpush.bf16.msra.mxu0 %v3397_v37  ;;  %v4581_v37 = vld [vmem:[%s7059_s1 + $0x214] sm:$0xf0] }
  0x49   :  { %870 = vmatpush.bf16.msra.mxu1 %v3525_v38  ;;  %v3241_v38 = vor.u32 %v4531_v29, %v3238_v30  ;;  %v3429_v46 = vor.u32 %v4581_v37, %v3428_v36  ;;  %v3462_v29 = vld [vmem:[%s7059_s1 + $0x258] sm:$0xf0]  ;;  %v3337_v30 = vor.u32 %v4555_v26, %v3334_v27  ;;  %v3844_v27 = vld [vmem:[%s7062_s3 + $0x240] sm:$0xf] }
  0x4a   :  { %836 = vmatpush.bf16.msra.mxu3 %v3205_v39  ;;  %v4575_v39 = vld [vmem:[%s7059_s1 + $0x1ec] sm:$0xf]  ;;  %v3446_v36 = vld [vmem:[%s7059_s1 + $0x238] sm:$0xf0] }
  0x4c   :  { %852 = vmatpush.bf16.msra.mxu0 %v3381_v47  ;;  %v3417_v47 = vor.u32 %v4575_v39, %v3414_v40  ;;  %v4547_v39 = vld [vmem:[%s7059_s1 + $0x10c] sm:$0xf]  ;;  %v3302_v40 = vld [vmem:[%s7059_s1 + $0x118] sm:$0xf0] }
  0x4d   :  { %871 = vmatpush.bf16.msra.mxu1 %v3509_v48  ;;  %v3545_v48 = vor.u32 %v4607_v41, %v3542_v42  ;;  %v4579_v41 = vld [vmem:[%s7059_s1 + $0x20c] sm:$0xf]  ;;  %v3430_v42 = vld [vmem:[%s7059_s1 + $0x218] sm:$0xf0] }
  0x4e   :  { %837 = vmatpush.bf16.msra.mxu3 %v3189_v49  ;;  %v3225_v49 = vor.u32 %v4527_v43, %v3222_v44  ;;  %v3724_v43 = vld [vmem:[%s7062_s3 + $0x150] sm:$0xf]  ;;  %v4655_v44 = vld [vmem:[%s7062_s3 + $0x164] sm:$0xf0] }
  0x50   :  { %853 = vmatpush.bf16.msra.mxu0 %v3365_v2  ;;  %v4599_v2 = vld [vmem:[%s7059_s1 + $0x2ac] sm:$0xf] }
  0x51   :  { %872 = vmatpush.bf16.msra.mxu1 %v3493_v4  ;;  %v3510_v4 = vld [vmem:[%s7059_s1 + $0x2b8] sm:$0xf0] }
  0x52   :  { %838 = vmatpush.bf16.msra.mxu3 %v3173_v5  ;;  %v3209_v5 = vor.u32 %v4523_v59, %v3206_v61  ;;  %v3513_v8 = vor.u32 %v4599_v2, %v3510_v4  ;;  %v4631_v61 = vld [vmem:[%s7062_s3 + $0xa4] sm:$0xf0]  ;;  %v3556_v4 = vld [vmem:[%s7062_s3] sm:$0xf] }
  0x53   :  { %787 = vmatmul.bf16.gmra.mxu0 %v5242_v56 }
  0x54   :  { %854 = vmatpush.bf16.msra.mxu0 %v3349_v13  ;;  %806 = vmatmul.bf16.gmra.mxu1 %v5244_v57  ;;  %v3494_v13 = vld [vmem:[%s7059_s1 + $0x298] sm:$0xf0] }
  0x55   :  { %873 = vmatpush.bf16.msra.mxu1 %v3477_v14  ;;  %3549 = vmatmul.msk.bf16.gmra.mxu2 %vm659_vm1, %v5142_v3  ;;  %v3193_v14 = vor.u32 %v4519_v7, %v3190_v9  ;;  %v3497_v17 = vor.u32 %v4595_v12, %v3494_v13  ;;  %v3916_v7 = vld [vmem:[%s7062_s3 + $0x2d0] sm:$0xf]  ;;  %v4697_v12 = vld [vmem:[%s7062_s3 + $0x2b4] sm:$0xf0] }
  0x56   :  { %907 = vmatpush.bf16.msrb.mxu3 %v3289_v10  ;;  %v4563_v10 = vld [vmem:[%s7059_s1 + $0x18c] sm:$0xf] }
  0x57   :  { %839 = vmatmul.bf16.vlgmr.msra.gmra.mxu3 %v5121_v58  ;;  %v3369_v15 = vor.u32 %v4563_v10, %v3366_v11  ;;  %v3892_v11 = vld [vmem:[%s7062_s3 + $0x2a0] sm:$0xf] }
  0x58   :  { %855 = vmatpush.bf16.msra.mxu0 %v3333_v22  ;;  %v3478_v22 = vld [vmem:[%s7059_s1 + $0x278] sm:$0xf0]  ;;  %v3893_v13 = vor.u32 %v4697_v12, %v3892_v11 }
  0x59   :  { %874 = vmatpush.bf16.msra.mxu1 %v3461_v23  ;;  %v3177_v23 = vor.u32 %v4515_v16, %v3174_v18  ;;  %v3481_v25 = vor.u32 %v4591_v21, %v3478_v22  ;;  %v4691_v18 = vld [vmem:[%s7062_s3 + $0x284] sm:$0xf0]  ;;  %v4640_v22 = vld [vmem:[%s7062_s3 + $0xf4] sm:$0xf] }
  0x5a   :  { %908 = vmatpush.bf16.msrb.mxu3 %v3273_v19  ;;  %v4559_v19 = vld [vmem:[%s7059_s1 + $0x16c] sm:$0xf] }
  0x5b   :  { %v3353_v24 = vor.u32 %v4559_v19, %v3350_v20  ;;  %v5670_v19 = vld [vmem:[%s7061_s2] sm:$0xf] }
  0x5c   :  { %856 = vmatpush.bf16.msra.mxu0 %v3317_v31 }
  0x5d   :  { %875 = vmatpush.bf16.msra.mxu1 %v3445_v33  ;;  %v3318_v33 = vld [vmem:[%s7059_s1 + $0x138] sm:$0xf0] }
  0x5e   :  { %909 = vmatpush.bf16.msrb.mxu3 %v3257_v28  ;;  %v4587_v28 = vld [vmem:[%s7059_s1 + $0x24c] sm:$0xf]  ;;  %v3321_v37 = vor.u32 %v4551_v32, %v3318_v33  ;;  %v3654_v32 = vld [vmem:[%s7062_s3 + $0xd8] sm:$0xf0] }
  0x5f   :  { %v3465_v31 = vor.u32 %v4587_v28, %v3462_v29  ;;  %v4685_v28 = vld [vmem:[%s7062_s3 + $0x254] sm:$0xf0] }
  0x60   :  { %857 = vmatpush.bf16.msra.mxu0 %v3301_v45  ;;  %v3700_v45 = vld [vmem:[%s7062_s3 + $0x120] sm:$0xf] }
  0x61   :  { %876 = vmatpush.bf16.msra.mxu1 %v3429_v46  ;;  %v3305_v46 = vor.u32 %v4547_v39, %v3302_v40  ;;  %v4628_v39 = vld [vmem:[%s7062_s3 + $0x94] sm:$0xf]  ;;  %v3630_v40 = vld [vmem:[%s7062_s3 + $0xa8] sm:$0xf0] }
  0x62   :  { %910 = vmatpush.bf16.msrb.mxu3 %v3241_v38  ;;  %v3449_v38 = vor.u32 %v4583_v34, %v3446_v36  ;;  %v3820_v36 = vld [vmem:[%s7062_s3 + $0x210] sm:$0xf] }
  0x63   :  { %858 = vmatmul.bf16.vlgmr.msra.gmra.mxu0 %v5132_v63 }
  0x64   :  { %926 = vmatpush.bf16.msrb.mxu0 %v3417_v47  ;;  %877 = vmatmul.bf16.vlgmr.msra.gmra.mxu1 %v5134_v0  ;;  %v3725_v47 = vor.u32 %v4655_v44, %v3724_v43 }
  0x65   :  { %945 = vmatpush.bf16.msrb.mxu1 %v3545_v48  ;;  %3550 = vmatmul.msk.bf16.vlgmr.msra.gmra.mxu2 %vm659_vm1, %v4998_v53  ;;  %v4649_v48 = vld [vmem:[%s7062_s3 + $0x134] sm:$0xf0] }
  0x66   :  { %911 = vmatpush.bf16.msrb.mxu3 %v3225_v49  ;;  %v3701_v49 = vor.u32 %v4649_v48, %v3700_v45 }
  0x67   :  { %844 = vmatmul.bf16.gmra.mxu3 %v5233_v50 }
  0x68   :  { %927 = vmatpush.bf16.msrb.mxu0 %v3401_v55  ;;  %v4637_v55 = vld [vmem:[%s7062_s3 + $0xd4] sm:$0xf0] }
  0x69   :  { %946 = vmatpush.bf16.msrb.mxu1 %v3529_v60  ;;  %v3653_v59 = vor.u32 %v4637_v55, %v3652_v54  ;;  %v3628_v60 = vld [vmem:[%s7062_s3 + $0x90] sm:$0xf] }
  0x6a   :  { %912 = vmatpush.bf16.msrb.mxu3 %v3209_v5  ;;  %v3629_v62 = vor.u32 %v4631_v61, %v3628_v60  ;;  %v4613_v5 = vld [vmem:[%s7062_s3 + $0x14] sm:$0xf0]  ;;  %v3772_v55 = vld [vmem:[%s7062_s3 + $0x1b0] sm:$0xf] }
  0x6c   :  { %928 = vmatpush.bf16.msrb.mxu0 %v3385_v6  ;;  %v3557_v6 = vor.u32 %v4613_v5, %v3556_v4  ;;  %v3748_v5 = vld [vmem:[%s7062_s3 + $0x180] sm:$0xf] }
  0x6d   :  { %947 = vmatpush.bf16.msrb.mxu1 %v3513_v8  ;;  %v4703_v8 = vld [vmem:[%s7062_s3 + $0x2e4] sm:$0xf0] }
  0x6e   :  { %913 = vmatpush.bf16.msrb.mxu3 %v3193_v14  ;;  %v3917_v10 = vor.u32 %v4703_v8, %v3916_v7  ;;  %v4646_v14 = vld [vmem:[%s7062_s3 + $0x124] sm:$0xf] }
  0x70   :  { %929 = vmatpush.bf16.msrb.mxu0 %v3369_v15  ;;  %v3702_v15 = vld [vmem:[%s7062_s3 + $0x138] sm:$0xf0] }
  0x71   :  { %948 = vmatpush.bf16.msrb.mxu1 %v3497_v17  ;;  %v3705_v16 = vor.u32 %v4646_v14, %v3702_v15  ;;  %v3868_v17 = vld [vmem:[%s7062_s3 + $0x270] sm:$0xf]  ;;  %v4751_v14 = vld [vmem:[%s7062_s3 + $0x464] sm:$0xf0] }
  0x72   :  { %914 = vmatpush.bf16.msrb.mxu3 %v3177_v23  ;;  %v3869_v20 = vor.u32 %v4691_v18, %v3868_v17  ;;  %v3678_v23 = vld [vmem:[%s7062_s3 + $0x108] sm:$0xf0] }
  0x73   :  { %863 = vmatmul.bf16.gmra.mxu0 %v5242_v56  ;;  %v3918_v17 = vld [vmem:[%s7062_s3 + $0x2e8] sm:$0xf0] }
  0x74   :  { %930 = vmatpush.bf16.msrb.mxu0 %v3353_v24  ;;  %882 = vmatmul.bf16.gmra.mxu1 %v5244_v57  ;;  %v3681_v24 = vor.u32 %v4640_v22, %v3678_v23  ;;  %v4656_v22 = vld [vmem:[%s7062_s3 + $0x16c] sm:$0xf0] }
  0x75   :  { %949 = vmatpush.bf16.msrb.mxu1 %v3481_v25  ;;  %3551 = vmatmul.msk.bf16.gmra.mxu2 %vm659_vm1, %v5142_v3  ;;  %v5679_v25 = vperm.slane %v5670_v19, 0 }
  0x76   :  { %2159 = vmatpush.bf16.msra.mxu3 %v3725_v47  ;;  %v4673_v47 = vld [vmem:[%s7062_s3 + $0x1f4] sm:$0xf0] }
  0x77   :  { %915 = vmatmul.bf16.vlgmr.msrb.gmra.mxu3 %v5121_v58  ;;  %v3433_v58 = vor.u32 %v4579_v41, %v3430_v42  ;;  %v3633_v42 = vor.u32 %v4628_v39, %v3630_v40  ;;  %v4650_v39 = vld [vmem:[%s7062_s3 + $0x13c] sm:$0xf0] }
  0x78   :  { %931 = vmatpush.bf16.msrb.mxu0 %v3337_v30  ;;  %v3845_v30 = vor.u32 %v4685_v28, %v3844_v27 }
  0x79   :  { %950 = vmatpush.bf16.msrb.mxu1 %v3465_v31  ;;  %v4634_v31 = vld [vmem:[%s7062_s3 + $0xc4] sm:$0xf] }
  0x7a   :  { %2160 = vmatpush.bf16.msra.mxu3 %v3701_v49  ;;  %v3657_v33 = vor.u32 %v4634_v31, %v3654_v32  ;;  %v4694_v31 = vld [vmem:[%s7062_s3 + $0x2a4] sm:$0xf] }
  0x7c   :  { %932 = vmatpush.bf16.msrb.mxu0 %v3321_v37  ;;  %v4679_v37 = vld [vmem:[%s7062_s3 + $0x224] sm:$0xf0] }
  0x7d   :  { %951 = vmatpush.bf16.msrb.mxu1 %v3449_v38  ;;  %v3821_v38 = vor.u32 %v4679_v37, %v3820_v36 }
  0x7e   :  { %2161 = vmatpush.bf16.msra.mxu3 %v3677_v35  ;;  %v3609_v35 = vor.u32 %v4622_v51, %v3606_v52  ;;  %v4644_v51 = vld [vmem:[%s7062_s3 + $0x10c] sm:$0xf0] }
  0x80   :  { %933 = vmatpush.bf16.msrb.mxu0 %v3305_v46  ;;  %v3796_v46 = vld [vmem:[%s7062_s3 + $0x1e0] sm:$0xf] }
  0x81   :  { %952 = vmatpush.bf16.msrb.mxu1 %v3433_v58  ;;  %v3797_v58 = vor.u32 %v4673_v47, %v3796_v46  ;;  %v3870_v46 = vld [vmem:[%s7062_s3 + $0x288] sm:$0xf0] }
  0x82   :  { %2162 = vmatpush.bf16.msra.mxu3 %v3653_v59  ;;  %v4667_v59 = vld [vmem:[%s7062_s3 + $0x1c4] sm:$0xf0] }
  0x83   :  { %934 = vmatmul.bf16.vlgmr.msrb.gmra.mxu0 %v5132_v63  ;;  %v3604_v63 = vld [vmem:[%s7062_s3 + $0x60] sm:$0xf]  ;;  %v3773_v60 = vor.u32 %v4667_v59, %v3772_v55 }
  0x84   :  { %953 = vmatmul.bf16.vlgmr.msrb.gmra.mxu1 %v5134_v0  ;;  %2178 = vmatpush.bf16.msra.mxu0 %v3917_v10 }
  0x85   :  { %3552 = vmatmul.msk.bf16.vlgmr.msrb.gmra.mxu2 %vm659_vm1, %v4998_v53  ;;  %v4625_v53 = vld [vmem:[%s7062_s3 + $0x74] sm:$0xf0] }
  0x86   :  { %2163 = vmatpush.bf16.msra.mxu3 %v3629_v62  ;;  %v3605_v0 = vor.u32 %v4625_v53, %v3604_v63  ;;  %v4616_v62 = vld [vmem:[%s7062_s3 + $0x34] sm:$0xf]  ;;  %v3582_v63 = vld [vmem:[%s7062_s3 + $0x48] sm:$0xf0] }
  0x87   :  { %920 = vmatmul.bf16.gmra.mxu3 %v5233_v50  ;;  %v3580_v50 = vld [vmem:[%s7062_s3 + $0x30] sm:$0xf] }
  0x88   :  { %v3581_v2 = vor.u32 %v4619_v1, %v3580_v50  ;;  %2179 = vmatpush.bf16.msra.mxu0 %v3893_v13  ;;  %v4108_v13 = vld [vmem:[%s7062_s3 + $0x450] sm:$0xf] }
  0x89   :  { %v4109_v15 = vor.u32 %v4751_v14, %v4108_v13  ;;  %v3636_v14 = vld [vmem:[%s7062_s3 + $0x98] sm:$0xf] }
  0x8a   :  { %2164 = vmatpush.bf16.msra.mxu3 %v3605_v0  ;;  %v3585_v0 = vor.u32 %v4616_v62, %v3582_v63  ;;  %v4733_v62 = vld [vmem:[%s7062_s3 + $0x3d4] sm:$0xf0]  ;;  %v4682_v63 = vld [vmem:[%s7062_s3 + $0x244] sm:$0xf] }
  0x8b   :  { %2197 = vmatpush.bf16.msra.mxu1 %v4109_v15  ;;  %v4632_v15 = vld [vmem:[%s7062_s3 + $0xac] sm:$0xf0] }
  0x8c   :  { %2180 = vmatpush.bf16.msra.mxu0 %v3869_v20 }
  0x8e   :  { %2165 = vmatpush.bf16.msra.mxu3 %v3581_v2 }
  0x90   :  { %2181 = vmatpush.bf16.msra.mxu0 %v3845_v30  ;;  %v4745_v30 = vld [vmem:[%s7062_s3 + $0x434] sm:$0xf0] }
  0x92   :  { %2166 = vmatpush.bf16.msra.mxu3 %v3557_v6  ;;  %v4661_v6 = vld [vmem:[%s7062_s3 + $0x194] sm:$0xf0] }
  0x93   :  { %939 = vmatmul.bf16.gmra.mxu0 %v5242_v56  ;;  %v4652_v56 = vld [vmem:[%s7062_s3 + $0x154] sm:$0xf]  ;;  %v3749_v8 = vor.u32 %v4661_v6, %v3748_v5  ;;  %v3660_v5 = vld [vmem:[%s7062_s3 + $0xc8] sm:$0xf]  ;;  %v4638_v6 = vld [vmem:[%s7062_s3 + $0xdc] sm:$0xf0] }
  0x94   :  { %958 = vmatmul.bf16.gmra.mxu1 %v5244_v57  ;;  %2182 = vmatpush.bf16.msra.mxu0 %v3821_v38  ;;  %v3708_v38 = vld [vmem:[%s7062_s3 + $0x128] sm:$0xf] }
  0x95   :  { %3553 = vmatmul.msk.bf16.gmra.mxu2 %vm659_vm1, %v5142_v3  ;;  %v3726_v3 = vld [vmem:[%s7062_s3 + $0x168] sm:$0xf0]  ;;  %v3709_v40 = vor.u32 %v4650_v39, %v3708_v38  ;;  %v4715_v38 = vld [vmem:[%s7062_s3 + $0x344] sm:$0xf0]  ;;  %v4664_v39 = vld [vmem:[%s7062_s3 + $0x1b4] sm:$0xf] }
  0x96   :  { %v3729_v57 = vor.u32 %v4652_v56, %v3726_v3  ;;  %v3558_v56 = vld [vmem:[%s7062_s3 + $0x18] sm:$0xf0] }
  0x98   :  { %v5641_v9 = vpop.f32.mrf.mxu3  ;;  %2235 = vmatpush.bf16.msrb.mxu3 %v3729_v57  ;;  %2183 = vmatpush.bf16.msra.mxu0 %v3797_v58 }
  0x9c   :  { %2236 = vmatpush.bf16.msrb.mxu3 %v3705_v16  ;;  %2184 = vmatpush.bf16.msra.mxu0 %v3773_v60  ;;  %v4700_v16 = vld [vmem:[%s7062_s3 + $0x2d4] sm:$0xf] }
  0x9d   :  { %v3921_v20 = vor.u32 %v4700_v16, %v3918_v17  ;;  %v3637_v17 = vor.u32 %v4632_v15, %v3636_v14 }
  0xa0   :  { %v747_v21 = vpop.f32.mrf.mxu3  ;;  %v688_v26 = vpop.f32.mrf.mxu0  ;;  %2237 = vmatpush.bf16.msrb.mxu3 %v3681_v24  ;;  %2185 = vmatpush.bf16.msra.mxu0 %v3749_v8 }
  0xa1   :  { %v707_v29 = vpop.f32.mrf.mxu1  ;;  %v689_v34 = vadd.f32 %v688_v26, %v5679_v25 }
  0xa3   :  { %v708_v43 = vadd.f32 %v707_v29, %v689_v34  ;;  %v4084_v29 = vld [vmem:[%s7062_s3 + $0x420] sm:$0xf]  ;;  %v3894_v34 = vld [vmem:[%s7062_s3 + $0x2b8] sm:$0xf0] }
  0xa4   :  { %2238 = vmatpush.bf16.msrb.mxu3 %v3657_v33  ;;  %2254 = vmatpush.bf16.msrb.mxu0 %v3921_v20  ;;  %v4085_v33 = vor.u32 %v4745_v30, %v4084_v29  ;;  %v3897_v37 = vor.u32 %v4694_v31, %v3894_v34  ;;  %v3798_v29 = vld [vmem:[%s7062_s3 + $0x1f8] sm:$0xf0]  ;;  %v4626_v34 = vld [vmem:[%s7062_s3 + $0x7c] sm:$0xf0] }
  0xa6   :  { %2198 = vmatpush.bf16.msra.mxu1 %v4085_v33  ;;  %v3612_v33 = vld [vmem:[%s7062_s3 + $0x68] sm:$0xf] }
  0xa8   :  { %v726_v41 = vpop.f32.mrf.mxu2  ;;  %v690_v44 = vpop.f32.mrf.mxu0  ;;  %2239 = vmatpush.bf16.msrb.mxu3 %v3633_v42  ;;  %2255 = vmatpush.bf16.msrb.mxu0 %v3897_v37  ;;  %v4060_v42 = vld [vmem:[%s7062_s3 + $0x3f0] sm:$0xf] }
  0xa9   :  { %v709_v48 = vpop.f32.mrf.mxu1  ;;  %v691_v49 = vadd.f32 %v690_v44, %v5679_v25  ;;  %v727_v54 = vadd.f32 %v726_v41, %v708_v43  ;;  %v4688_v44 = vld [vmem:[%s7062_s3 + $0x274] sm:$0xf]  ;;  %v3964_v37 = vld [vmem:[%s7062_s3 + $0x330] sm:$0xf] }
  0xaa   :  { %v5706_v45 = vpop.f32.mrf.mxu3  ;;  %v3873_v58 = vor.u32 %v4688_v44, %v3870_v46  ;;  %v3588_v44 = vld [vmem:[%s7062_s3 + $0x38] sm:$0xf]  ;;  %v4620_v46 = vld [vmem:[%s7062_s3 + $0x4c] sm:$0xf0] }
  0xab   :  { %v710_v61 = vadd.f32 %v709_v48, %v691_v49  ;;  %v746_v50 = vadd.f32 %v5641_v9, %v727_v54  ;;  %v4610_v9 = vld [vmem:[%s7062_s3 + $0x4] sm:$0xf]  ;;  %v5802_v48 = vperm.slane %v5670_v19, 1  ;;  %v3684_v49 = vld [vmem:[%s7062_s3 + $0xf8] sm:$0xf] }
  0xac   :  { %2240 = vmatpush.bf16.msrb.mxu3 %v3609_v35  ;;  %v3561_v3 = vor.u32 %v4610_v9, %v3558_v56  ;;  %v3685_v35 = vor.u32 %v4644_v51, %v3684_v49  ;;  %2256 = vmatpush.bf16.msrb.mxu0 %v3873_v58  ;;  %v4012_v9 = vld [vmem:[%s7062_s3 + $0x390] sm:$0xf]  ;;  %v3589_v58 = vor.u32 %v4620_v46, %v3588_v44 }
  0xad   :  { %v983_v57 = vmax.f32 %v746_v50, 0.0  ;;  %v4692_v44 = vld [vmem:[%s7062_s3 + $0x28c] sm:$0xf0] }
  0xb0   :  { %v728_v53 = vpop.f32.mrf.mxu2  ;;  %v693_v2 = vpop.f32.mrf.mxu0  ;;  %2241 = vmatpush.bf16.msrb.mxu3 %v3585_v0 }
  0xb1   :  { %v729_v1 = vadd.f32 %v728_v53, %v710_v61  ;;  %v712_v7 = vpop.f32.mrf.mxu1  ;;  %v694_v12 = vadd.f32 %v693_v2, %v5679_v25  ;;  %v4036_v61 = vld [vmem:[%s7062_s3 + $0x3c0] sm:$0xf] }
  0xb2   :  { %v5734_v4 = vpop.f32.mrf.mxu3  ;;  %v4037_v0 = vor.u32 %v4733_v62, %v4036_v61  ;;  %v3750_v61 = vld [vmem:[%s7062_s3 + $0x198] sm:$0xf0] }
  0xb3   :  { %v748_v10 = vadd.f32 %v747_v21, %v729_v1  ;;  %v3732_v21 = vld [vmem:[%s7062_s3 + $0x158] sm:$0xf]  ;;  %v713_v26 = vadd.f32 %v712_v7, %v694_v12  ;;  %v3661_v7 = vor.u32 %v4638_v6, %v3660_v5  ;;  %v4300_v5 = vld [vmem:[%s7062_s3 + $0x5d0] sm:$0xf]  ;;  %v4799_v6 = vld [vmem:[%s7062_s3 + $0x5e4] sm:$0xf0] }
  0xb4   :  { %2242 = vmatpush.bf16.msrb.mxu3 %v3561_v3  ;;  %v3733_v24 = vor.u32 %v4656_v22, %v3732_v21  ;;  %v4676_v3 = vld [vmem:[%s7062_s3 + $0x214] sm:$0xf] }
  0xb5   :  { %v987_v11 = vmax.f32 %v748_v10, 0.0 }
  0xb7   :  { %v5761_v18 = vpack.c.bf16 %v987_v11, %v983_v57  ;;  %v3822_v57 = vld [vmem:[%s7062_s3 + $0x228] sm:$0xf0] }
  0xb8   :  { %v731_v23 = vpop.f32.mrf.mxu2  ;;  %v695_v27 = vpop.f32.mrf.mxu0  ;;  %v3825_v13 = vor.u32 %v4676_v3, %v3822_v57 }
  0xb9   :  { %2167 = vmatmul.bf16.vlgmr.msra.gmra.mxu3 %v5761_v18  ;;  %v714_v32 = vpop.f32.mrf.mxu1  ;;  %v696_v36 = vadd.f32 %v695_v27, %v5679_v25  ;;  %v732_v41 = vadd.f32 %v731_v23, %v713_v26  ;;  %v4739_v25 = vld [vmem:[%s7062_s3 + $0x404] sm:$0xf0]  ;;  %v3988_v23 = vld [vmem:[%s7062_s3 + $0x360] sm:$0xf]  ;;  %v4670_v26 = vld [vmem:[%s7062_s3 + $0x1e4] sm:$0xf] }
  0xba   :  { %v764_v28 = vpop.f32.mrf.mxu3  ;;  %2311 = vmatpush.bf16.msra.mxu3 %v3733_v24  ;;  %v4061_v43 = vor.u32 %v4739_v25, %v4060_v42  ;;  %v4721_v24 = vld [vmem:[%s7062_s3 + $0x374] sm:$0xf0] }
  0xbb   :  { %v715_v47 = vadd.f32 %v714_v32, %v696_v36  ;;  %v751_v54 = vadd.f32 %v5706_v45, %v732_v41  ;;  %v3846_v45 = vld [vmem:[%s7062_s3 + $0x258] sm:$0xf0]  ;;  %v765_v50 = vadd.f32 %v764_v28, %v5802_v48  ;;  %v3989_v28 = vor.u32 %v4721_v24, %v3988_v23  ;;  %v3774_v41 = vld [vmem:[%s7062_s3 + $0x1c8] sm:$0xf0]  ;;  %v4742_v23 = vld [vmem:[%s7062_s3 + $0x424] sm:$0xf] }
  0xbc   :  { %2199 = vmatpush.bf16.msra.mxu1 %v4061_v43  ;;  %v3849_v2 = vor.u32 %v4682_v63, %v3846_v45  ;;  %v3801_v32 = vor.u32 %v4670_v26, %v3798_v29  ;;  %v3613_v36 = vor.u32 %v4626_v34, %v3612_v33  ;;  %v3777_v43 = vor.u32 %v4664_v39, %v3774_v41  ;;  %v3564_v45 = vld [vmem:[%s7062_s3 + $0x8] sm:$0xf]  ;;  %v4086_v26 = vld [vmem:[%s7062_s3 + $0x438] sm:$0xf0]  ;;  %v4647_v33 = vld [vmem:[%s7062_s3 + $0x12c] sm:$0xf] }
  0xbd   :  { %v991_v8 = vmax.f32 %v751_v54, 0.0  ;;  %v4709_v54 = vld [vmem:[%s7062_s3 + $0x314] sm:$0xf0]  ;;  %v3710_v34 = vld [vmem:[%s7062_s3 + $0x140] sm:$0xf0] }
  0xbe   :  { %2312 = vmatpush.bf16.msra.mxu3 %v3709_v40  ;;  %2257 = vmatpush.bf16.msrb.mxu0 %v3849_v2  ;;  %v3965_v40 = vor.u32 %v4715_v38, %v3964_v37  ;;  %v4252_v37 = vld [vmem:[%s7062_s3 + $0x570] sm:$0xf]  ;;  %v4787_v38 = vld [vmem:[%s7062_s3 + $0x584] sm:$0xf0]  ;;  %v4062_v41 = vld [vmem:[%s7062_s3 + $0x408] sm:$0xf0] }
  0xbf   :  { %v4253_v39 = vor.u32 %v4787_v38, %v4252_v37  ;;  %v4674_v37 = vld [vmem:[%s7062_s3 + $0x1fc] sm:$0xf0] }
  0xc0   :  { %v733_v52 = vpop.f32.mrf.mxu2  ;;  %v783_v60 = vpop.f32.mrf.mxu0  ;;  %2200 = vmatpush.bf16.msra.mxu1 %v4037_v0 }
  0xc1   :  { %v734_v55 = vadd.f32 %v733_v52, %v715_v47  ;;  %v802_v53 = vpop.f32.mrf.mxu1  ;;  %v784_v12 = vadd.f32 %v783_v60, %v765_v50  ;;  %v4614_v50 = vld [vmem:[%s7062_s3 + $0x1c] sm:$0xf0] }
  0xc2   :  { %v766_v59 = vpop.f32.mrf.mxu3  ;;  %2313 = vmatpush.bf16.msra.mxu3 %v3685_v35  ;;  %2258 = vmatpush.bf16.msrb.mxu0 %v3825_v13  ;;  %v3940_v35 = vld [vmem:[%s7062_s3 + $0x300] sm:$0xf]  ;;  %v3734_v13 = vld [vmem:[%s7062_s3 + $0x170] sm:$0xf0] }
  0xc3   :  { %v753_v1 = vadd.f32 %v5734_v4, %v734_v55  ;;  %v4727_v4 = vld [vmem:[%s7062_s3 + $0x3a4] sm:$0xf0]  ;;  %v767_v20 = vadd.f32 %v766_v59, %v5802_v48  ;;  %v803_v30 = vadd.f32 %v802_v53, %v784_v12  ;;  %v4658_v55 = vld [vmem:[%s7062_s3 + $0x184] sm:$0xf]  ;;  %v3941_v60 = vor.u32 %v4709_v54, %v3940_v35  ;;  %v4653_v12 = vld [vmem:[%s7062_s3 + $0x15c] sm:$0xf] }
  0xc4   :  { %v4013_v56 = vor.u32 %v4727_v4, %v4012_v9  ;;  %v3753_v0 = vor.u32 %v4658_v55, %v3750_v61  ;;  %v3924_v9 = vld [vmem:[%s7062_s3 + $0x2d8] sm:$0xf]  ;;  %v4704_v4 = vld [vmem:[%s7062_s3 + $0x2ec] sm:$0xf0]  ;;  %v3737_v15 = vor.u32 %v4653_v12, %v3734_v13  ;;  %v4724_v12 = vld [vmem:[%s7062_s3 + $0x394] sm:$0xf] }
  0xc5   :  { %v995_v10 = vmax.f32 %v753_v1, 0.0  ;;  %v3565_v1 = vor.u32 %v4614_v50, %v3564_v45  ;;  %v3925_v57 = vor.u32 %v4704_v4, %v3924_v9  ;;  %v4781_v61 = vld [vmem:[%s7062_s3 + $0x554] sm:$0xf0]  ;;  %v4038_v45 = vld [vmem:[%s7062_s3 + $0x3d8] sm:$0xf0] }
  0xc6   :  { %2314 = vmatpush.bf16.msra.mxu3 %v3661_v7  ;;  %2201 = vmatpush.bf16.msra.mxu1 %v4013_v56  ;;  %v4748_v7 = vld [vmem:[%s7062_s3 + $0x454] sm:$0xf]  ;;  %v3852_v50 = vld [vmem:[%s7062_s3 + $0x248] sm:$0xf]  ;;  %v3662_v9 = vld [vmem:[%s7062_s3 + $0xe0] sm:$0xf0] }
  0xc7   :  { %v5843_v11 = vpack.c.bf16 %v995_v10, %v991_v8  ;;  %2259 = vmatpush.bf16.msrb.mxu0 %v3801_v32  ;;  %v4301_v8 = vor.u32 %v4799_v6, %v4300_v5  ;;  %v4110_v10 = vld [vmem:[%s7062_s3 + $0x468] sm:$0xf0] }
  0xc8   :  { %v821_v16 = vpop.f32.mrf.mxu2  ;;  %v785_v22 = vpop.f32.mrf.mxu0  ;;  %v4113_v3 = vor.u32 %v4748_v7, %v4110_v10  ;;  %v4635_v10 = vld [vmem:[%s7062_s3 + $0xcc] sm:$0xf] }
  0xc9   :  { %2172 = vmatmul.bf16.gmra.mxu3 %v5843_v11  ;;  %v804_v27 = vpop.f32.mrf.mxu1  ;;  %v786_v31 = vadd.f32 %v785_v22, %v767_v20  ;;  %v822_v42 = vadd.f32 %v821_v16, %v803_v30  ;;  %2216 = vmatpush.bf16.msra.mxu2 %v4301_v8  ;;  %v4793_v22 = vld [vmem:[%s7062_s3 + $0x5b4] sm:$0xf0]  ;;  %v3665_v4 = vor.u32 %v4635_v10, %v3662_v9  ;;  %v3942_v9 = vld [vmem:[%s7062_s3 + $0x318] sm:$0xf0] }
  0xca   :  { %v769_v21 = vpop.f32.mrf.mxu3  ;;  %2315 = vmatpush.bf16.msra.mxu3 %v3637_v17  ;;  %2202 = vmatpush.bf16.msra.mxu1 %v3989_v28  ;;  %v4698_v28 = vld [vmem:[%s7062_s3 + $0x2bc] sm:$0xf0] }
  0xcb   :  { %v805_v25 = vadd.f32 %v804_v27, %v786_v31  ;;  %2260 = vmatpush.bf16.msrb.mxu0 %v3777_v43  ;;  %v984_v62 = vmax.f32 %v822_v42, 0.0  ;;  %v770_v63 = vadd.f32 %v769_v21, %v5802_v48  ;;  %v4276_v21 = vld [vmem:[%s7062_s3 + $0x5a0] sm:$0xf]  ;;  %v3900_v27 = vld [vmem:[%s7062_s3 + $0x2a8] sm:$0xf]  ;;  %v4089_v31 = vor.u32 %v4742_v23, %v4086_v26 }
  0xcc   :  { %v3901_v32 = vor.u32 %v4698_v28, %v3900_v27  ;;  %v3876_v42 = vld [vmem:[%s7062_s3 + $0x278] sm:$0xf]  ;;  %v3638_v23 = vld [vmem:[%s7062_s3 + $0xb0] sm:$0xf0] }
  0xce   :  { %2316 = vmatpush.bf16.msra.mxu3 %v3613_v36  ;;  %2203 = vmatpush.bf16.msra.mxu1 %v3965_v40  ;;  %v3713_v36 = vor.u32 %v4647_v33, %v3710_v34  ;;  %v4736_v40 = vld [vmem:[%s7062_s3 + $0x3f4] sm:$0xf]  ;;  %v3990_v34 = vld [vmem:[%s7062_s3 + $0x378] sm:$0xf0] }
  0xcf   :  { %2261 = vmatpush.bf16.msrb.mxu0 %v3753_v0  ;;  %v4065_v43 = vor.u32 %v4736_v40, %v4062_v41 }
  0xd0   :  { %v823_v47 = vpop.f32.mrf.mxu2  ;;  %v788_v52 = vpop.f32.mrf.mxu0 }
  0xd1   :  { %v824_v49 = vadd.f32 %v823_v47, %v805_v25  ;;  %v807_v59 = vpop.f32.mrf.mxu1  ;;  %v789_v56 = vadd.f32 %v788_v52, %v770_v63  ;;  %v5977_v25 = vperm.slane %v5670_v19, 2 }
  0xd2   :  { %v771_v51 = vpop.f32.mrf.mxu3  ;;  %2317 = vmatpush.bf16.msra.mxu3 %v3589_v58  ;;  %2204 = vmatpush.bf16.msra.mxu1 %v3941_v60  ;;  %v3877_v58 = vor.u32 %v4692_v44, %v3876_v42  ;;  %v4228_v60 = vld [vmem:[%s7062_s3 + $0x540] sm:$0xf]  ;;  %v4623_v42 = vld [vmem:[%s7062_s3 + $0x6c] sm:$0xf] }
  0xd3   :  { %v988_v53 = vmax.f32 %v824_v49, 0.0  ;;  %v772_v16 = vadd.f32 %v771_v51, %v5802_v48  ;;  %v4277_v48 = vor.u32 %v4793_v22, %v4276_v21  ;;  %v808_v29 = vadd.f32 %v807_v59, %v789_v56  ;;  %v4641_v49 = vld [vmem:[%s7062_s3 + $0xfc] sm:$0xf]  ;;  %v3686_v51 = vld [vmem:[%s7062_s3 + $0x110] sm:$0xf0] }
  0xd4   :  { %v3689_v35 = vor.u32 %v4641_v49, %v3686_v51  ;;  %v4229_v0 = vor.u32 %v4781_v61, %v4228_v60  ;;  %v4629_v22 = vld [vmem:[%s7062_s3 + $0x9c] sm:$0xf]  ;;  %v4712_v49 = vld [vmem:[%s7062_s3 + $0x334] sm:$0xf]  ;;  %v3966_v51 = vld [vmem:[%s7062_s3 + $0x348] sm:$0xf0] }
  0xd5   :  { %v5908_v2 = vpack.c.bf16 %v988_v53, %v984_v62  ;;  %2217 = vmatpush.bf16.msra.mxu2 %v4277_v48  ;;  %v4730_v62 = vld [vmem:[%s7062_s3 + $0x3c4] sm:$0xf]  ;;  %v3641_v48 = vor.u32 %v4629_v22, %v3638_v23  ;;  %v4617_v61 = vld [vmem:[%s7062_s3 + $0x3c] sm:$0xf]  ;;  %v4302_v22 = vld [vmem:[%s7062_s3 + $0x5e8] sm:$0xf0] }
  0xd6   :  { %2318 = vmatpush.bf16.msra.mxu3 %v3565_v1  ;;  %2273 = vmatpush.bf16.msrb.mxu1 %v4113_v3  ;;  %v4686_v1 = vld [vmem:[%s7062_s3 + $0x25c] sm:$0xf0]  ;;  %v4041_v7 = vor.u32 %v4730_v62, %v4038_v45  ;;  %v4204_v3 = vld [vmem:[%s7062_s3 + $0x510] sm:$0xf]  ;;  %v3590_v62 = vld [vmem:[%s7062_s3 + $0x50] sm:$0xf0] }
  0xd7   :  { %2186 = vmatmul.bf16.vlgmr.msra.gmra.mxu0 %v5908_v2  ;;  %v3853_v8 = vor.u32 %v4686_v1, %v3852_v50  ;;  %v4132_v1 = vld [vmem:[%s7062_s3 + $0x480] sm:$0xf] }
  0xd8   :  { %v826_v14 = vpop.f32.mrf.mxu2  ;;  %v790_v17 = vpop.f32.mrf.mxu0  ;;  %2330 = vmatpush.bf16.msra.mxu0 %v3925_v57  ;;  %v4775_v57 = vld [vmem:[%s7062_s3 + $0x524] sm:$0xf0] }
  0xd9   :  { %2243 = vmatmul.bf16.vlgmr.msrb.gmra.mxu3 %v5761_v18  ;;  %v809_v24 = vpop.f32.mrf.mxu1  ;;  %v791_v30 = vadd.f32 %v790_v17, %v772_v16  ;;  %v827_v46 = vadd.f32 %v826_v14, %v808_v29  ;;  %2218 = vmatpush.bf16.msra.mxu2 %v4253_v39  ;;  %v4205_v13 = vor.u32 %v4775_v57, %v4204_v3  ;;  %v4014_v14 = vld [vmem:[%s7062_s3 + $0x3a8] sm:$0xf0]  ;;  %v4680_v16 = vld [vmem:[%s7062_s3 + $0x22c] sm:$0xf0]  ;;  %v4180_v29 = vld [vmem:[%s7062_s3 + $0x4e0] sm:$0xf] }
  0xda   :  { %v840_v20 = vpop.f32.mrf.mxu3  ;;  %2387 = vmatpush.bf16.msrb.mxu3 %v3737_v15  ;;  %2274 = vmatpush.bf16.msrb.mxu1 %v4089_v31  ;;  %v3828_v15 = vld [vmem:[%s7062_s3 + $0x218] sm:$0xf]  ;;  %v4718_v31 = vld [vmem:[%s7062_s3 + $0x364] sm:$0xf]  ;;  %v4662_v3 = vld [vmem:[%s7062_s3 + $0x19c] sm:$0xf0] }
  0xdb   :  { %v810_v47 = vadd.f32 %v809_v24, %v791_v30  ;;  %v841_v63 = vadd.f32 %v840_v20, %v5977_v25  ;;  %v992_v5 = vmax.f32 %v827_v46, 0.0  ;;  %v4017_v20 = vor.u32 %v4724_v12, %v4014_v14  ;;  %v4769_v30 = vld [vmem:[%s7062_s3 + $0x4f4] sm:$0xf0]  ;;  %v4156_v46 = vld [vmem:[%s7062_s3 + $0x4b0] sm:$0xf] }
  0xdc   :  { %2331 = vmatpush.bf16.msra.mxu0 %v3901_v32  ;;  %v3829_v21 = vor.u32 %v4680_v16, %v3828_v15  ;;  %v4181_v33 = vor.u32 %v4769_v30, %v4180_v29  ;;  %v3993_v40 = vor.u32 %v4718_v31, %v3990_v34  ;;  %v4611_v15 = vld [vmem:[%s7062_s3 + $0xc] sm:$0xf]  ;;  %v3566_v16 = vld [vmem:[%s7062_s3 + $0x20] sm:$0xf0]  ;;  %v3926_v29 = vld [vmem:[%s7062_s3 + $0x2f0] sm:$0xf0] }
  0xdd   :  { %2219 = vmatpush.bf16.msra.mxu2 %v4229_v0 }
  0xde   :  { %2388 = vmatpush.bf16.msrb.mxu3 %v3713_v36  ;;  %2275 = vmatpush.bf16.msrb.mxu1 %v4065_v43  ;;  %v3804_v36 = vld [vmem:[%s7062_s3 + $0x1e8] sm:$0xf]  ;;  %v3614_v43 = vld [vmem:[%s7062_s3 + $0x80] sm:$0xf0] }
  0xdf   :  { %v3805_v41 = vor.u32 %v4674_v37, %v3804_v36  ;;  %v3617_v44 = vor.u32 %v4623_v42, %v3614_v43 }
  0xe0   :  { %v828_v52 = vpop.f32.mrf.mxu2  ;;  %v859_v59 = vpop.f32.mrf.mxu0  ;;  %2332 = vmatpush.bf16.msra.mxu0 %v3877_v58 }
  0xe1   :  { %v829_v54 = vadd.f32 %v828_v52, %v810_v47  ;;  %v878_v53 = vpop.f32.mrf.mxu1  ;;  %v860_v17 = vadd.f32 %v859_v59, %v841_v63  ;;  %2220 = vmatpush.bf16.msra.mxu2 %v4205_v13  ;;  %v4763_v47 = vld [vmem:[%s7062_s3 + $0x4c4] sm:$0xf0]  ;;  %v3780_v52 = vld [vmem:[%s7062_s3 + $0x1b8] sm:$0xf] }
  0xe2   :  { %v842_v55 = vpop.f32.mrf.mxu3  ;;  %2389 = vmatpush.bf16.msrb.mxu3 %v3689_v35  ;;  %2276 = vmatpush.bf16.msrb.mxu1 %v4041_v7  ;;  %v4157_v58 = vor.u32 %v4763_v47, %v4156_v46  ;;  %v3969_v35 = vor.u32 %v4712_v49, %v3966_v51  ;;  %v4746_v46 = vld [vmem:[%s7062_s3 + $0x43c] sm:$0xf0]  ;;  %v4695_v47 = vld [vmem:[%s7062_s3 + $0x2ac] sm:$0xf]  ;;  %v3902_v49 = vld [vmem:[%s7062_s3 + $0x2c0] sm:$0xf0] }
  0xe3   :  { %v996_v6 = vmax.f32 %v829_v54, 0.0  ;;  %v843_v26 = vadd.f32 %v842_v55, %v5977_v25  ;;  %v879_v38 = vadd.f32 %v878_v53, %v860_v17  ;;  %v4668_v54 = vld [vmem:[%s7062_s3 + $0x1cc] sm:$0xf0]  ;;  %v3593_v53 = vor.u32 %v4617_v61, %v3590_v62  ;;  %v4068_v61 = vld [vmem:[%s7062_s3 + $0x3f8] sm:$0xf] }
  0xe4   :  { %2333 = vmatpush.bf16.msra.mxu0 %v3853_v8  ;;  %v3781_v60 = vor.u32 %v4668_v54, %v3780_v52  ;;  %v3569_v17 = vor.u32 %v4611_v15, %v3566_v16  ;;  %v3716_v51 = vld [vmem:[%s7062_s3 + $0x130] sm:$0xf]  ;;  %v4651_v52 = vld [vmem:[%s7062_s3 + $0x144] sm:$0xf0] }
  0xe5   :  { %v6013_v56 = vpack.c.bf16 %v996_v6, %v992_v5  ;;  %2221 = vmatpush.bf16.msra.mxu2 %v4181_v33  ;;  %v4757_v5 = vld [vmem:[%s7062_s3 + $0x494] sm:$0xf0]  ;;  %v4706_v6 = vld [vmem:[%s7062_s3 + $0x304] sm:$0xf]  ;;  %v3717_v54 = vor.u32 %v4651_v52, %v3716_v51  ;;  %v4740_v62 = vld [vmem:[%s7062_s3 + $0x40c] sm:$0xf0] }
  0xe6   :  { %2390 = vmatpush.bf16.msrb.mxu3 %v3665_v4  ;;  %2277 = vmatpush.bf16.msrb.mxu1 %v4017_v20  ;;  %v4133_v10 = vor.u32 %v4757_v5, %v4132_v1  ;;  %v3756_v4 = vld [vmem:[%s7062_s3 + $0x188] sm:$0xf]  ;;  %v3945_v13 = vor.u32 %v4706_v6, %v3942_v9  ;;  %v4657_v33 = vld [vmem:[%s7062_s3 + $0x174] sm:$0xf0]  ;;  %v3878_v1 = vld [vmem:[%s7062_s3 + $0x290] sm:$0xf0] }
  0xe7   :  { %2191 = vmatmul.bf16.gmra.mxu0 %v6013_v56  ;;  %v3757_v14 = vor.u32 %v4662_v3, %v3756_v4 }
  0xe8   :  { %v897_v24 = vpop.f32.mrf.mxu2  ;;  %v861_v28 = vpop.f32.mrf.mxu0  ;;  %2334 = vmatpush.bf16.msra.mxu0 %v3829_v21  ;;  %v4796_v21 = vld [vmem:[%s7062_s3 + $0x5d4] sm:$0xf] }
  0xe9   :  { %2248 = vmatmul.bf16.gmra.mxu3 %v5843_v11  ;;  %v880_v32 = vpop.f32.mrf.mxu1  ;;  %v862_v39 = vadd.f32 %v861_v28, %v843_v26  ;;  %v898_v55 = vadd.f32 %v897_v24, %v879_v38  ;;  %2222 = vmatpush.bf16.msra.mxu2 %v4157_v58  ;;  %v4305_v23 = vor.u32 %v4796_v21, %v4302_v22  ;;  %v4116_v24 = vld [vmem:[%s7062_s3 + $0x458] sm:$0xf]  ;;  %v4701_v26 = vld [vmem:[%s7062_s3 + $0x2dc] sm:$0xf]  ;;  %v4734_v21 = vld [vmem:[%s7062_s3 + $0x3dc] sm:$0xf0] }
  0xea   :  { %v845_v27 = vpop.f32.mrf.mxu3  ;;  %2391 = vmatpush.bf16.msrb.mxu3 %v3641_v48  ;;  %2278 = vmatpush.bf16.msrb.mxu1 %v3993_v40  ;;  %v4752_v48 = vld [vmem:[%s7062_s3 + $0x46c] sm:$0xf0]  ;;  %v3929_v31 = vor.u32 %v4701_v26, %v3926_v29  ;;  %v4790_v40 = vld [vmem:[%s7062_s3 + $0x5a4] sm:$0xf]  ;;  %v4683_v22 = vld [vmem:[%s7062_s3 + $0x24c] sm:$0xf] }
  0xeb   :  { %v881_v59 = vadd.f32 %v880_v32, %v862_v39  ;;  %v846_v7 = vadd.f32 %v845_v27, %v5977_v25  ;;  %v985_v57 = vmax.f32 %v898_v55, 0.0  ;;  %v4117_v28 = vor.u32 %v4752_v48, %v4116_v24  ;;  %v3740_v32 = vld [vmem:[%s7062_s3 + $0x160] sm:$0xf]  ;;  %v4784_v55 = vld [vmem:[%s7062_s3 + $0x574] sm:$0xf] }
  0xec   :  { %2335 = vmatpush.bf16.msra.mxu0 %v3805_v41  ;;  %v3741_v38 = vor.u32 %v4657_v33, %v3740_v32  ;;  %v4278_v41 = vld [vmem:[%s7062_s3 + $0x5b8] sm:$0xf0]  ;;  %v3854_v24 = vld [vmem:[%s7062_s3 + $0x260] sm:$0xf0]  ;;  %v3668_v48 = vld [vmem:[%s7062_s3 + $0xd0] sm:$0xf] }
  0xed   :  { %2223 = vmatpush.bf16.msra.mxu2 %v4133_v10  ;;  %v4639_v26 = vld [vmem:[%s7062_s3 + $0xe4] sm:$0xf0]  ;;  %v4020_v32 = vld [vmem:[%s7062_s3 + $0x398] sm:$0xf] }
  0xee   :  { %2392 = vmatpush.bf16.msrb.mxu3 %v3617_v44  ;;  %2279 = vmatpush.bf16.msrb.mxu1 %v3969_v35  ;;  %v4281_v44 = vor.u32 %v4790_v40, %v4278_v41  ;;  %v3905_v35 = vor.u32 %v4695_v47, %v3902_v49  ;;  %v3669_v29 = vor.u32 %v4639_v26, %v3668_v48  ;;  %v4766_v47 = vld [vmem:[%s7062_s3 + $0x4e4] sm:$0xf]  ;;  %v3996_v49 = vld [vmem:[%s7062_s3 + $0x368] sm:$0xf]  ;;  %v3572_v26 = vld [vmem:[%s7062_s3 + $0x10] sm:$0xf] }
  0xf0   :  { %v899_v63 = vpop.f32.mrf.mxu2  ;;  %v864_v50 = vpop.f32.mrf.mxu0  ;;  %2336 = vmatpush.bf16.msra.mxu0 %v3781_v60 }
  0xf1   :  { %v900_v0 = vadd.f32 %v899_v63, %v881_v59  ;;  %v883_v8 = vpop.f32.mrf.mxu1  ;;  %v865_v27 = vadd.f32 %v864_v50, %v846_v7  ;;  %2292 = vmatpush.bf16.msrb.mxu2 %v4305_v23  ;;  %v4254_v59 = vld [vmem:[%s7062_s3 + $0x588] sm:$0xf0]  ;;  %v4689_v63 = vld [vmem:[%s7062_s3 + $0x27c] sm:$0xf]  ;;  %v4069_v50 = vor.u32 %v4740_v62, %v4068_v61  ;;  %v3692_v7 = vld [vmem:[%s7062_s3 + $0x100] sm:$0xf] }
  0xf2   :  { %v847_v45 = vpop.f32.mrf.mxu3  ;;  %2393 = vmatpush.bf16.msrb.mxu3 %v3593_v53  ;;  %2280 = vmatpush.bf16.msrb.mxu1 %v3945_v13  ;;  %v4257_v60 = vor.u32 %v4784_v55, %v4254_v59  ;;  %v3881_v6 = vor.u32 %v4689_v63, %v3878_v1  ;;  %v4044_v13 = vld [vmem:[%s7062_s3 + $0x3c8] sm:$0xf]  ;;  %v3806_v55 = vld [vmem:[%s7062_s3 + $0x200] sm:$0xf0]  ;;  %v3620_v62 = vld [vmem:[%s7062_s3 + $0x70] sm:$0xf] }
  0xf3   :  { %v989_v12 = vmax.f32 %v900_v0, 0.0  ;;  %v848_v34 = vadd.f32 %v847_v45, %v5977_v25  ;;  %v4092_v25 = vld [vmem:[%s7062_s3 + $0x428] sm:$0xf]  ;;  %v884_v42 = vadd.f32 %v883_v8, %v865_v27  ;;  %v6185_v45 = vperm.slane %v5670_v19, 3  ;;  %v4645_v8 = vld [vmem:[%s7062_s3 + $0x114] sm:$0xf0] }
  0xf4   :  { %2337 = vmatpush.bf16.msra.mxu0 %v3757_v14  ;;  %v4093_v58 = vor.u32 %v4746_v46, %v4092_v25  ;;  %v3693_v9 = vor.u32 %v4645_v8, %v3692_v7  ;;  %v4045_v23 = vor.u32 %v4734_v21, %v4044_v13  ;;  %v3644_v25 = vld [vmem:[%s7062_s3 + $0xa0] sm:$0xf]  ;;  %v4627_v63 = vld [vmem:[%s7062_s3 + $0x84] sm:$0xf0]  ;;  %v4760_v1 = vld [vmem:[%s7062_s3 + $0x4b4] sm:$0xf] }
  0xf5   :  { %v6115_v20 = vpack.c.bf16 %v989_v12, %v985_v57  ;;  %2293 = vmatpush.bf16.msrb.mxu2 %v4281_v44  ;;  %v4778_v57 = vld [vmem:[%s7062_s3 + $0x544] sm:$0xf]  ;;  %v4230_v12 = vld [vmem:[%s7062_s3 + $0x558] sm:$0xf0]  ;;  %v4716_v8 = vld [vmem:[%s7062_s3 + $0x34c] sm:$0xf0] }
  0xf6   :  { %2394 = vmatpush.bf16.msrb.mxu3 %v3569_v17  ;;  %v4233_v17 = vor.u32 %v4778_v57, %v4230_v12  ;;  %v4754_v57 = vld [vmem:[%s7062_s3 + $0x484] sm:$0xf] }
  0xf7   :  { %2205 = vmatmul.bf16.vlgmr.msra.gmra.mxu1 %v6115_v20  ;;  %2262 = vmatmul.bf16.vlgmr.msrb.gmra.mxu0 %v5908_v2 }
  0xf8   :  { %v902_v30 = vpop.f32.mrf.mxu2  ;;  %v866_v36 = vpop.f32.mrf.mxu0  ;;  %2349 = vmatpush.bf16.msra.mxu1 %v4117_v28  ;;  %2406 = vmatpush.bf16.msrb.mxu0 %v3929_v31  ;;  %v3857_v28 = vor.u32 %v4683_v22, %v3854_v24  ;;  %v4206_v31 = vld [vmem:[%s7062_s3 + $0x528] sm:$0xf0] }
  0xf9   :  { %2319 = vmatmul.bf16.vlgmr.msra.gmra.mxu3 %v5761_v18  ;;  %v885_v39 = vpop.f32.mrf.mxu1  ;;  %v867_v43 = vadd.f32 %v866_v36, %v848_v34  ;;  %v903_v53 = vadd.f32 %v902_v30, %v884_v42  ;;  %2294 = vmatpush.bf16.msrb.mxu2 %v4257_v60  ;;  %v4772_v30 = vld [vmem:[%s7062_s3 + $0x514] sm:$0xf]  ;;  %v4728_v36 = vld [vmem:[%s7062_s3 + $0x3ac] sm:$0xf0]  ;;  %v4633_v42 = vld [vmem:[%s7062_s3 + $0xb4] sm:$0xf0] }
  0xfa   :  { %v916_v37 = vpop.f32.mrf.mxu3  ;;  %2463 = vmatpush.bf16.msra.mxu3 %v3741_v38  ;;  %v4209_v34 = vor.u32 %v4772_v30, %v4206_v31  ;;  %v3830_v38 = vld [vmem:[%s7062_s3 + $0x230] sm:$0xf0]  ;;  %v4021_v40 = vor.u32 %v4728_v36, %v4020_v32  ;;  %v3645_v46 = vor.u32 %v4633_v42, %v3644_v25  ;;  %v4659_v30 = vld [vmem:[%s7062_s3 + $0x18c] sm:$0xf]  ;;  %v3758_v31 = vld [vmem:[%s7062_s3 + $0x1a0] sm:$0xf0] }
  0xfb   :  { %v886_v0 = vadd.f32 %v885_v39, %v867_v43  ;;  %v993_v14 = vmax.f32 %v903_v53, 0.0  ;;  %v917_v15 = vadd.f32 %v916_v37, %v6185_v45  ;;  %v4677_v37 = vld [vmem:[%s7062_s3 + $0x21c] sm:$0xf]  ;;  %v4800_v25 = vld [vmem:[%s7062_s3 + $0x5ec] sm:$0xf0] }
  0xfc   :  { %2350 = vmatpush.bf16.msra.mxu1 %v4093_v58  ;;  %2407 = vmatpush.bf16.msrb.mxu0 %v3905_v35  ;;  %v3833_v41 = vor.u32 %v4677_v37, %v3830_v38  ;;  %v4182_v58 = vld [vmem:[%s7062_s3 + $0x4f8] sm:$0xf0]  ;;  %v4722_v35 = vld [vmem:[%s7062_s3 + $0x37c] sm:$0xf0] }
  0xfd   :  { %2295 = vmatpush.bf16.msrb.mxu2 %v4233_v17  ;;  %v4185_v52 = vor.u32 %v4766_v47, %v4182_v58  ;;  %v3997_v61 = vor.u32 %v4722_v35, %v3996_v49  ;;  %v4749_v42 = vld [vmem:[%s7062_s3 + $0x45c] sm:$0xf]  ;;  %v3932_v47 = vld [vmem:[%s7062_s3 + $0x2e0] sm:$0xf]  ;;  %v4705_v58 = vld [vmem:[%s7062_s3 + $0x2f4] sm:$0xf0] }
  0xfe   :  { %2464 = vmatpush.bf16.msra.mxu3 %v3717_v54  ;;  %v4671_v54 = vld [vmem:[%s7062_s3 + $0x1ec] sm:$0xf]  ;;  %v4654_v35 = vld [vmem:[%s7062_s3 + $0x164] sm:$0xf] }
 0x100   :  { %v904_v5 = vpop.f32.mrf.mxu2  ;;  %v935_v19 = vpop.f32.mrf.mxu0  ;;  %2351 = vmatpush.bf16.msra.mxu1 %v4069_v50  ;;  %2408 = vmatpush.bf16.msrb.mxu0 %v3881_v6  ;;  %v3621_v50 = vor.u32 %v4627_v63, %v3620_v62  ;;  %v3972_v6 = vld [vmem:[%s7062_s3 + $0x338] sm:$0xf]  ;;  %v4794_v62 = vld [vmem:[%s7062_s3 + $0x5bc] sm:$0xf0] }
 0x101   :  { %v905_v10 = vadd.f32 %v904_v5, %v886_v0  ;;  %v954_v3 = vpop.f32.mrf.mxu1  ;;  %v936_v33 = vadd.f32 %v935_v19, %v917_v15  ;;  %2296 = vmatpush.bf16.msrb.mxu2 %v4209_v34  ;;  %v3809_v0 = vor.u32 %v4671_v54, %v3806_v55  ;;  %v4158_v5 = vld [vmem:[%s7062_s3 + $0x4c8] sm:$0xf0]  ;;  %v3782_v19 = vld [vmem:[%s7062_s3 + $0x1d0] sm:$0xf0]  ;;  %v3948_v15 = vld [vmem:[%s7062_s3 + $0x308] sm:$0xf] }
 0x102   :  { %v918_v4 = vpop.f32.mrf.mxu3  ;;  %2465 = vmatpush.bf16.msra.mxu3 %v3693_v9  ;;  %v4161_v7 = vor.u32 %v4760_v1, %v4158_v5  ;;  %v3973_v9 = vor.u32 %v4716_v8, %v3972_v6  ;;  %v3742_v54 = vld [vmem:[%s7062_s3 + $0x178] sm:$0xf0]  ;;  %v4699_v6 = vld [vmem:[%s7062_s3 + $0x2c4] sm:$0xf0]  ;;  %v4648_v8 = vld [vmem:[%s7062_s3 + $0x134] sm:$0xf] }
 0x103   :  { %v997_v16 = vmax.f32 %v905_v10, 0.0  ;;  %v919_v43 = vadd.f32 %v918_v4, %v6185_v45  ;;  %v955_v59 = vadd.f32 %v954_v3, %v936_v33  ;;  %v4665_v10 = vld [vmem:[%s7062_s3 + $0x1bc] sm:$0xf]  ;;  %v3596_v4 = vld [vmem:[%s7062_s3 + $0x40] sm:$0xf] }
 0x104   :  { %2352 = vmatpush.bf16.msra.mxu1 %v4045_v23  ;;  %2409 = vmatpush.bf16.msrb.mxu0 %v3857_v28  ;;  %v4621_v3 = vld [vmem:[%s7062_s3 + $0x54] sm:$0xf0]  ;;  %v3785_v21 = vor.u32 %v4665_v10, %v3782_v19  ;;  %v4615_v28 = vld [vmem:[%s7062_s3 + $0x24] sm:$0xf0]  ;;  %v3718_v10 = vld [vmem:[%s7062_s3 + $0x148] sm:$0xf0] }
 0x105   :  { %v6221_v27 = vpack.c.bf16 %v997_v16, %v993_v14  ;;  %2297 = vmatpush.bf16.msrb.mxu2 %v4185_v52  ;;  %v4134_v14 = vld [vmem:[%s7062_s3 + $0x498] sm:$0xf0]  ;;  %v4710_v16 = vld [vmem:[%s7062_s3 + $0x31c] sm:$0xf0]  ;;  %v3597_v22 = vor.u32 %v4621_v3, %v3596_v4  ;;  %v3573_v37 = vor.u32 %v4615_v28, %v3572_v26  ;;  %v3933_v52 = vor.u32 %v4705_v58, %v3932_v47  ;;  %v4260_v19 = vld [vmem:[%s7062_s3 + $0x578] sm:$0xf] }
 0x106   :  { %2466 = vmatpush.bf16.msra.mxu3 %v3669_v29  ;;  %v4137_v48 = vor.u32 %v4754_v57, %v4134_v14  ;;  %v3949_v29 = vor.u32 %v4710_v16, %v3948_v15  ;;  %v4788_v4 = vld [vmem:[%s7062_s3 + $0x58c] sm:$0xf0]  ;;  %v4737_v3 = vld [vmem:[%s7062_s3 + $0x3fc] sm:$0xf]  ;;  %v4070_v57 = vld [vmem:[%s7062_s3 + $0x410] sm:$0xf0] }
 0x107   :  { %2210 = vmatmul.bf16.gmra.mxu1 %v6221_v27  ;;  %2267 = vmatmul.bf16.gmra.mxu0 %v6013_v56  ;;  %v4073_v14 = vor.u32 %v4737_v3, %v4070_v57  ;;  %v3884_v15 = vld [vmem:[%s7062_s3 + $0x280] sm:$0xf]  ;;  %v4693_v16 = vld [vmem:[%s7062_s3 + $0x294] sm:$0xf0]  ;;  %v4776_v47 = vld [vmem:[%s7062_s3 + $0x52c] sm:$0xf0] }
 0x108   :  { %v973_v39 = vpop.f32.mrf.mxu2  ;;  %v937_v44 = vpop.f32.mrf.mxu0  ;;  %2353 = vmatpush.bf16.msra.mxu1 %v4021_v40  ;;  %2410 = vmatpush.bf16.msrb.mxu0 %v3833_v41  ;;  %v4308_v41 = vld [vmem:[%s7062_s3 + $0x5d8] sm:$0xf]  ;;  %v4782_v26 = vld [vmem:[%s7062_s3 + $0x55c] sm:$0xf0]  ;;  %v4725_v58 = vld [vmem:[%s7062_s3 + $0x39c] sm:$0xf] }
 0x109   :  { %2324 = vmatmul.bf16.gmra.mxu3 %v5843_v11  ;;  %v956_v51 = vpop.f32.mrf.mxu1  ;;  %v938_v60 = vadd.f32 %v937_v44, %v919_v43  ;;  %v974_v12 = vadd.f32 %v973_v39, %v955_v59  ;;  %2298 = vmatpush.bf16.msrb.mxu2 %v4161_v7  ;;  %v3761_v39 = vor.u32 %v4659_v30, %v3758_v31  ;;  %v3974_v3 = vld [vmem:[%s7062_s3 + $0x350] sm:$0xf0] }
 0x10a   :  { %v921_v53 = vpop.f32.mrf.mxu3  ;;  %2467 = vmatpush.bf16.msra.mxu3 %v3645_v46  ;;  %v4309_v44 = vor.u32 %v4800_v25, %v4308_v41  ;;  %v4118_v46 = vld [vmem:[%s7062_s3 + $0x470] sm:$0xf0]  ;;  %v3670_v25 = vld [vmem:[%s7062_s3 + $0xe8] sm:$0xf0] }
 0x10b   :  { %v957_v13 = vadd.f32 %v956_v51, %v938_v60  ;;  %v986_v32 = vmax.f32 %v974_v12, 0.0  ;;  %v922_v33 = vadd.f32 %v921_v53, %v6185_v45  ;;  %v4121_v51 = vor.u32 %v4749_v42, %v4118_v46  ;;  %v4094_v53 = vld [vmem:[%s7062_s3 + $0x440] sm:$0xf0]  ;;  %v4636_v41 = vld [vmem:[%s7062_s3 + $0xd4] sm:$0xf] }
 0x10c   :  { %2354 = vmatpush.bf16.msra.mxu1 %v3997_v61  ;;  %2411 = vmatpush.bf16.msrb.mxu0 %v3809_v0  ;;  %v3745_v60 = vor.u32 %v4654_v35, %v3742_v54  ;;  %v4284_v61 = vld [vmem:[%s7062_s3 + $0x5a8] sm:$0xf]  ;;  %v3908_v0 = vld [vmem:[%s7062_s3 + $0x2b0] sm:$0xf]  ;;  %v4212_v46 = vld [vmem:[%s7062_s3 + $0x518] sm:$0xf] }
 0x10d   :  { %2299 = vmatpush.bf16.msrb.mxu2 %v4137_v48  ;;  %v4285_v63 = vor.u32 %v4794_v62, %v4284_v61  ;;  %v3909_v7 = vor.u32 %v4699_v6, %v3908_v0  ;;  %v4236_v48 = vld [vmem:[%s7062_s3 + $0x548] sm:$0xf]  ;;  %v4681_v35 = vld [vmem:[%s7062_s3 + $0x234] sm:$0xf0]  ;;  %v3998_v0 = vld [vmem:[%s7062_s3 + $0x380] sm:$0xf0] }
 0x10e   :  { %2468 = vmatpush.bf16.msra.mxu3 %v3621_v50  ;;  %v4237_v31 = vor.u32 %v4782_v26, %v4236_v48  ;;  %v4188_v62 = vld [vmem:[%s7062_s3 + $0x4e8] sm:$0xf]  ;;  %v4624_v6 = vld [vmem:[%s7062_s3 + $0x74] sm:$0xf]  ;;  %v4707_v48 = vld [vmem:[%s7062_s3 + $0x30c] sm:$0xf] }
 0x10f   :  { %v3950_v26 = vld [vmem:[%s7062_s3 + $0x320] sm:$0xf0] }
 0x110   :  { %v975_v17 = vpop.f32.mrf.mxu2  ;;  %v940_v24 = vpop.f32.mrf.mxu0  ;;  %2355 = vmatpush.bf16.msra.mxu1 %v3973_v9  ;;  %2412 = vmatpush.bf16.msrb.mxu0 %v3785_v21  ;;  %v3721_v9 = vor.u32 %v4648_v8, %v3718_v10  ;;  %v4164_v8 = vld [vmem:[%s7062_s3 + $0x4b8] sm:$0xf] }
 0x111   :  { %v976_v23 = vadd.f32 %v975_v17, %v957_v13  ;;  %v959_v36 = vpop.f32.mrf.mxu1  ;;  %v941_v43 = vadd.f32 %v940_v24, %v922_v33  ;;  %v4261_v13 = vor.u32 %v4788_v4, %v4260_v19  ;;  %v4642_v17 = vld [vmem:[%s7062_s3 + $0x104] sm:$0xf]  ;;  %v3694_v24 = vld [vmem:[%s7062_s3 + $0x118] sm:$0xf0] }
 0x112   :  { %2469 = vmatpush.bf16.msra.mxu3 %v3597_v22  ;;  %v923_v40 = vpop.f32.mrf.mxu3  ;;  %v4046_v33 = vld [vmem:[%s7062_s3 + $0x3e0] sm:$0xf0]  ;;  %v4713_v4 = vld [vmem:[%s7062_s3 + $0x33c] sm:$0xf] }
 0x113   :  { %v990_v34 = vmax.f32 %v976_v23, 0.0  ;;  %v924_v55 = vadd.f32 %v923_v40, %v6185_v45  ;;  %v4743_v45 = vld [vmem:[%s7062_s3 + $0x42c] sm:$0xf]  ;;  %v960_v50 = vadd.f32 %v959_v36, %v941_v43  ;;  %v3885_v23 = vor.u32 %v4693_v16, %v3884_v15  ;;  %v4687_v40 = vld [vmem:[%s7062_s3 + $0x264] sm:$0xf0] }
 0x114   :  { %2356 = vmatpush.bf16.msra.mxu1 %v3949_v29  ;;  %2413 = vmatpush.bf16.msrb.mxu0 %v3761_v39  ;;  %v4097_v5 = vor.u32 %v4743_v45, %v4094_v53  ;;  %v3697_v29 = vor.u32 %v4642_v17, %v3694_v24  ;;  %v4719_v53 = vld [vmem:[%s7062_s3 + $0x36c] sm:$0xf]  ;;  %v4618_v15 = vld [vmem:[%s7062_s3 + $0x44] sm:$0xf]  ;;  %v3598_v16 = vld [vmem:[%s7062_s3 + $0x58] sm:$0xf0] }
 0x115   :  { %v6324_v38 = vpack.c.bf16 %v990_v34, %v986_v32  ;;  %v4731_v32 = vld [vmem:[%s7062_s3 + $0x3cc] sm:$0xf]  ;;  %v3860_v34 = vld [vmem:[%s7062_s3 + $0x250] sm:$0xf]  ;;  %v4140_v17 = vld [vmem:[%s7062_s3 + $0x488] sm:$0xf] }
 0x116   :  { %2470 = vmatpush.bf16.msra.mxu3 %v3573_v37  ;;  %v4049_v39 = vor.u32 %v4731_v32, %v4046_v33  ;;  %v3861_v43 = vor.u32 %v4687_v40, %v3860_v34  ;;  %v3574_v32 = vld [vmem:[%s7062_s3 + $0x28] sm:$0xf0] }
 0x117   :  { %2224 = vmatmul.bf16.vlgmr.msra.gmra.mxu2 %v6324_v38  ;;  %2281 = vmatmul.bf16.vlgmr.msrb.gmra.mxu1 %v6115_v20 }
 0x118   :  { %2338 = vmatmul.bf16.vlgmr.msra.gmra.mxu0 %v5908_v2  ;;  %v978_v49 = vpop.f32.mrf.mxu2  ;;  %v942_v59 = vpop.f32.mrf.mxu0  ;;  %2368 = vmatpush.bf16.msra.mxu2 %v4309_v44  ;;  %v3673_v44 = vor.u32 %v4636_v41, %v3670_v25  ;;  %v4753_v41 = vld [vmem:[%s7062_s3 + $0x474] sm:$0xf0]  ;;  %v4702_v25 = vld [vmem:[%s7062_s3 + $0x2e4] sm:$0xf] }
 0x119   :  { %2395 = vmatmul.bf16.vlgmr.msrb.gmra.mxu3 %v5761_v18  ;;  %2425 = vmatpush.bf16.msrb.mxu1 %v4121_v51  ;;  %v943_v1 = vadd.f32 %v942_v59, %v924_v55  ;;  %v961_v12 = vpop.f32.mrf.mxu1  ;;  %v979_v21 = vadd.f32 %v978_v49, %v960_v50  ;;  %v4213_v49 = vor.u32 %v4776_v47, %v4212_v46  ;;  %v4022_v51 = vld [vmem:[%s7062_s3 + $0x3b0] sm:$0xf0]  ;;  %v4630_v55 = vld [vmem:[%s7062_s3 + $0xa4] sm:$0xf]  ;;  %v3646_v59 = vld [vmem:[%s7062_s3 + $0xb8] sm:$0xf0] }
 0x11a   :  { %2482 = vmatpush.bf16.msra.mxu0 %v3933_v52  ;;  %2539 = vmatpush.bf16.msrb.mxu3 %v3745_v60  ;;  %v3836_v52 = vld [vmem:[%s7062_s3 + $0x220] sm:$0xf]  ;;  %v4025_v54 = vor.u32 %v4725_v58, %v4022_v51  ;;  %v3649_v61 = vor.u32 %v4630_v55, %v3646_v59  ;;  %v3812_v50 = vld [vmem:[%s7062_s3 + $0x1f0] sm:$0xf]  ;;  %v4791_v47 = vld [vmem:[%s7062_s3 + $0x5ac] sm:$0xf] }
 0x11b   :  { %v962_v22 = vadd.f32 %v961_v12, %v943_v1  ;;  %v994_v36 = vmax.f32 %v979_v21, 0.0  ;;  %v3837_v60 = vor.u32 %v4681_v35, %v3836_v52  ;;  %v4001_v1 = vor.u32 %v4719_v53, %v3998_v0  ;;  %v4758_v21 = vld [vmem:[%s7062_s3 + $0x49c] sm:$0xf0]  ;;  %v4286_v58 = vld [vmem:[%s7062_s3 + $0x5c0] sm:$0xf0] }
 0x11c   :  { %2369 = vmatpush.bf16.msra.mxu2 %v4285_v63  ;;  %v4770_v63 = vld [vmem:[%s7062_s3 + $0x4fc] sm:$0xf0]  ;;  %v3977_v12 = vor.u32 %v4713_v4, %v3974_v3  ;;  %v4141_v24 = vor.u32 %v4758_v21, %v4140_v17  ;;  %v4100_v51 = vld [vmem:[%s7062_s3 + $0x430] sm:$0xf]  ;;  %v4747_v52 = vld [vmem:[%s7062_s3 + $0x444] sm:$0xf0] }
 0x11d   :  { %2426 = vmatpush.bf16.msrb.mxu1 %v4097_v5  ;;  %v4189_v45 = vor.u32 %v4770_v63, %v4188_v62  ;;  %v4675_v5 = vld [vmem:[%s7062_s3 + $0x204] sm:$0xf0]  ;;  %v4696_v35 = vld [vmem:[%s7062_s3 + $0x2b4] sm:$0xf]  ;;  %v3910_v55 = vld [vmem:[%s7062_s3 + $0x2c8] sm:$0xf0] }
 0x11e   :  { %2483 = vmatpush.bf16.msra.mxu0 %v3909_v7  ;;  %2540 = vmatpush.bf16.msrb.mxu3 %v3721_v9  ;;  %v3622_v7 = vld [vmem:[%s7062_s3 + $0x88] sm:$0xf0]  ;;  %v3813_v10 = vor.u32 %v4675_v5, %v3812_v50  ;;  %v4764_v9 = vld [vmem:[%s7062_s3 + $0x4cc] sm:$0xf0]  ;;  %v3913_v59 = vor.u32 %v4696_v35, %v3910_v55  ;;  %v4076_v62 = vld [vmem:[%s7062_s3 + $0x400] sm:$0xf] }
 0x11f   :  { %v3625_v19 = vor.u32 %v4624_v6, %v3622_v7  ;;  %v4165_v57 = vor.u32 %v4764_v9, %v4164_v8  ;;  %v4690_v53 = vld [vmem:[%s7062_s3 + $0x284] sm:$0xf]  ;;  %v3886_v0 = vld [vmem:[%s7062_s3 + $0x298] sm:$0xf0]  ;;  %v4779_v5 = vld [vmem:[%s7062_s3 + $0x54c] sm:$0xf] }
 0x120   :  { %v980_v28 = vpop.f32.mrf.mxu2  ;;  %2370 = vmatpush.bf16.msra.mxu2 %v4261_v13  ;;  %v3788_v13 = vld [vmem:[%s7062_s3 + $0x1c0] sm:$0xf]  ;;  %v4238_v6 = vld [vmem:[%s7062_s3 + $0x560] sm:$0xf0]  ;;  %v4052_v8 = vld [vmem:[%s7062_s3 + $0x3d0] sm:$0xf] }
 0x121   :  { %v981_v30 = vadd.f32 %v980_v28, %v962_v22  ;;  %2427 = vmatpush.bf16.msrb.mxu1 %v4073_v14  ;;  %v4669_v14 = vld [vmem:[%s7062_s3 + $0x1d4] sm:$0xf0]  ;;  %v3601_v22 = vor.u32 %v4618_v15, %v3598_v16  ;;  %v3764_v28 = vld [vmem:[%s7062_s3 + $0x190] sm:$0xf]  ;;  %v4241_v7 = vor.u32 %v4779_v5, %v4238_v6  ;;  %v3862_v4 = vld [vmem:[%s7062_s3 + $0x268] sm:$0xf0] }
 0x122   :  { %2484 = vmatpush.bf16.msra.mxu0 %v3885_v23  ;;  %2541 = vmatpush.bf16.msrb.mxu3 %v3697_v29  ;;  %v3789_v23 = vor.u32 %v4669_v14, %v3788_v13  ;;  %v3953_v29 = vor.u32 %v4707_v48, %v3950_v26  ;;  %v4028_v13 = vld [vmem:[%s7062_s3 + $0x3a0] sm:$0xf]  ;;  %v4729_v15 = vld [vmem:[%s7062_s3 + $0x3b4] sm:$0xf0]  ;;  %v4678_v16 = vld [vmem:[%s7062_s3 + $0x224] sm:$0xf] }
 0x123   :  { %v998_v37 = vmax.f32 %v981_v30, 0.0  ;;  %v4663_v30 = vld [vmem:[%s7062_s3 + $0x1a4] sm:$0xf0]  ;;  %v3838_v17 = vld [vmem:[%s7062_s3 + $0x238] sm:$0xf0]  ;;  %v4029_v21 = vor.u32 %v4729_v15, %v4028_v13 }
 0x124   :  { %2371 = vmatpush.bf16.msra.mxu2 %v4237_v31  ;;  %v4612_v31 = vld [vmem:[%s7062_s3 + $0x14] sm:$0xf]  ;;  %v3765_v33 = vor.u32 %v4663_v30, %v3764_v28  ;;  %v4004_v26 = vld [vmem:[%s7062_s3 + $0x370] sm:$0xf]  ;;  %v4723_v28 = vld [vmem:[%s7062_s3 + $0x384] sm:$0xf0] }
 0x125   :  { %v6427_v42 = vpack.c.bf16 %v998_v37, %v994_v36  ;;  %2428 = vmatpush.bf16.msrb.mxu1 %v4049_v39  ;;  %v3577_v34 = vor.u32 %v4612_v31, %v3574_v32  ;;  %v4797_v36 = vld [vmem:[%s7062_s3 + $0x5dc] sm:$0xf]  ;;  %v4310_v37 = vld [vmem:[%s7062_s3 + $0x5f0] sm:$0xf0]  ;;  %v4124_v39 = vld [vmem:[%s7062_s3 + $0x460] sm:$0xf]  ;;  %v4005_v30 = vor.u32 %v4723_v28, %v4004_v26 }
 0x126   :  { %2542 = vmatpush.bf16.msrb.mxu3 %v3673_v44  ;;  %2485 = vmatpush.bf16.msra.mxu0 %v3861_v43  ;;  %v4313_v40 = vor.u32 %v4797_v36, %v4310_v37  ;;  %v3934_v43 = vld [vmem:[%s7062_s3 + $0x2f8] sm:$0xf0]  ;;  %v4125_v44 = vor.u32 %v4753_v41, %v4124_v39  ;;  %v3814_v31 = vld [vmem:[%s7062_s3 + $0x208] sm:$0xf0]  ;;  %v3980_v36 = vld [vmem:[%s7062_s3 + $0x340] sm:$0xf] }
 0x127   :  { %2229 = vmatmul.bf16.gmra.mxu2 %v6427_v42  ;;  %2286 = vmatmul.bf16.gmra.mxu1 %v6221_v27  ;;  %v3937_v46 = vor.u32 %v4702_v25, %v3934_v43  ;;  %v4717_v39 = vld [vmem:[%s7062_s3 + $0x354] sm:$0xf0]  ;;  %v3790_v41 = vld [vmem:[%s7062_s3 + $0x1d8] sm:$0xf0]  ;;  %v4755_v43 = vld [vmem:[%s7062_s3 + $0x48c] sm:$0xf] }
 0x128   :  { %2343 = vmatmul.bf16.gmra.mxu0 %v6013_v56  ;;  %2372 = vmatpush.bf16.msra.mxu2 %v4213_v49  ;;  %v4289_v49 = vor.u32 %v4791_v47, %v4286_v58  ;;  %v3981_v25 = vor.u32 %v4717_v39, %v3980_v36  ;;  %v3956_v58 = vld [vmem:[%s7062_s3 + $0x310] sm:$0xf]  ;;  %v3766_v35 = vld [vmem:[%s7062_s3 + $0x1a8] sm:$0xf0]  ;;  %v4316_v55 = vld [vmem:[%s7062_s3 + $0x5e0] sm:$0xf] }
 0x129   :  { %2400 = vmatmul.bf16.gmra.mxu3 %v5843_v11  ;;  %2429 = vmatpush.bf16.msrb.mxu1 %v4025_v54  ;;  %v4101_v54 = vor.u32 %v4747_v52, %v4100_v51  ;;  %v4660_v51 = vld [vmem:[%s7062_s3 + $0x194] sm:$0xf]  ;;  %v4268_v6 = vld [vmem:[%s7062_s3 + $0x580] sm:$0xf]  ;;  %v4196_v26 = vld [vmem:[%s7062_s3 + $0x4f0] sm:$0xf] }
 0x12a   :  { %2543 = vmatpush.bf16.msrb.mxu3 %v3649_v61  ;;  %2486 = vmatpush.bf16.msra.mxu0 %v3837_v60  ;;  %v4785_v60 = vld [vmem:[%s7062_s3 + $0x57c] sm:$0xf]  ;;  %v4262_v61 = vld [vmem:[%s7062_s3 + $0x590] sm:$0xf0]  ;;  %v4220_v15 = vld [vmem:[%s7062_s3 + $0x520] sm:$0xf] }
 0x12b   :  { %v4265_v63 = vor.u32 %v4785_v60, %v4262_v61  ;;  %v4750_v60 = vld [vmem:[%s7062_s3 + $0x464] sm:$0xf]  ;;  %v4771_v28 = vld [vmem:[%s7062_s3 + $0x504] sm:$0xf0]  ;;  %v3982_v39 = vld [vmem:[%s7062_s3 + $0x358] sm:$0xf0] }
 0x12c   :  { %2373 = vmatpush.bf16.msra.mxu2 %v4189_v45  ;;  %v4741_v45 = vld [vmem:[%s7062_s3 + $0x414] sm:$0xf0]  ;;  %v4714_v36 = vld [vmem:[%s7062_s3 + $0x344] sm:$0xf] }
 0x12d   :  { %2430 = vmatpush.bf16.msrb.mxu1 %v4001_v1  ;;  %v4077_v50 = vor.u32 %v4741_v45, %v4076_v62  ;;  %v3889_v1 = vor.u32 %v4690_v53, %v3886_v0  ;;  %v4126_v62 = vld [vmem:[%s7062_s3 + $0x478] sm:$0xf0]  ;;  %v4292_v45 = vld [vmem:[%s7062_s3 + $0x5b0] sm:$0xf]  ;;  %v4795_v53 = vld [vmem:[%s7062_s3 + $0x5c4] sm:$0xf0] }
 0x12e   :  { %2544 = vmatpush.bf16.msrb.mxu3 %v3625_v19  ;;  %2487 = vmatpush.bf16.msra.mxu0 %v3813_v10  ;;  %v4735_v10 = vld [vmem:[%s7062_s3 + $0x3e4] sm:$0xf0]  ;;  %v4684_v19 = vld [vmem:[%s7062_s3 + $0x254] sm:$0xf]  ;;  %v4293_v0 = vor.u32 %v4795_v53, %v4292_v45 }
 0x12f   :  { %v4053_v9 = vor.u32 %v4735_v10, %v4052_v8  ;;  %v3865_v3 = vor.u32 %v4684_v19, %v3862_v4  ;;  %v4078_v10 = vld [vmem:[%s7062_s3 + $0x418] sm:$0xf0]  ;;  %v4244_v19 = vld [vmem:[%s7062_s3 + $0x550] sm:$0xf] }
 0x130   :  { %2374 = vmatpush.bf16.msra.mxu2 %v4165_v57  ;;  %v4773_v57 = vld [vmem:[%s7062_s3 + $0x51c] sm:$0xf] }
 0x131   :  { %2431 = vmatpush.bf16.msrb.mxu1 %v3977_v12  ;;  %v4214_v12 = vld [vmem:[%s7062_s3 + $0x530] sm:$0xf0] }
 0x132   :  { %2545 = vmatpush.bf16.msrb.mxu3 %v3601_v22  ;;  %2488 = vmatpush.bf16.msra.mxu0 %v3789_v23  ;;  %v4217_v14 = vor.u32 %v4773_v57, %v4214_v12  ;;  %v3841_v22 = vor.u32 %v4678_v16, %v3838_v17  ;;  %v4767_v23 = vld [vmem:[%s7062_s3 + $0x4ec] sm:$0xf]  ;;  %v4732_v57 = vld [vmem:[%s7062_s3 + $0x3d4] sm:$0xf]  ;;  %v4777_v16 = vld [vmem:[%s7062_s3 + $0x534] sm:$0xf0] }
 0x133   :  { %v4054_v12 = vld [vmem:[%s7062_s3 + $0x3e8] sm:$0xf0]  ;;  %v4726_v17 = vld [vmem:[%s7062_s3 + $0x3a4] sm:$0xf] }
 0x134   :  { %2375 = vmatpush.bf16.msra.mxu2 %v4141_v24  ;;  %v4190_v24 = vld [vmem:[%s7062_s3 + $0x500] sm:$0xf0]  ;;  %v4057_v13 = vor.u32 %v4732_v57, %v4054_v12  ;;  %v4222_v57 = vld [vmem:[%s7062_s3 + $0x538] sm:$0xf0] }
 0x135   :  { %2432 = vmatpush.bf16.msrb.mxu1 %v3953_v29  ;;  %v4193_v48 = vor.u32 %v4767_v23, %v4190_v24  ;;  %v4672_v29 = vld [vmem:[%s7062_s3 + $0x1f4] sm:$0xf]  ;;  %v4030_v23 = vld [vmem:[%s7062_s3 + $0x3b8] sm:$0xf0] }
 0x136   :  { %2546 = vmatpush.bf16.msrb.mxu3 %v3577_v34  ;;  %2489 = vmatpush.bf16.msra.mxu0 %v3765_v33  ;;  %v3817_v32 = vor.u32 %v4672_v29, %v3814_v31  ;;  %v4761_v33 = vld [vmem:[%s7062_s3 + $0x4bc] sm:$0xf]  ;;  %v4166_v34 = vld [vmem:[%s7062_s3 + $0x4d0] sm:$0xf0]  ;;  %v4033_v24 = vor.u32 %v4726_v17, %v4030_v23  ;;  %v4197_v29 = vor.u32 %v4771_v28, %v4196_v26  ;;  %v4006_v31 = vld [vmem:[%s7062_s3 + $0x388] sm:$0xf0] }
 0x137   :  { %2300 = vmatmul.bf16.vlgmr.msrb.gmra.mxu2 %v6324_v38  ;;  %2357 = vmatmul.bf16.vlgmr.msra.gmra.mxu1 %v6115_v20  ;;  %v4169_v37 = vor.u32 %v4761_v33, %v4166_v34  ;;  %v4808_v33 = vld [vmem:[%s7063_s4 + $0x30] sm:$0xff]  ;;  %v4765_v34 = vld [vmem:[%s7062_s3 + $0x4d4] sm:$0xf0] }
 0x138   :  { %2414 = vmatmul.bf16.vlgmr.msrb.gmra.mxu0 %v5908_v2  ;;  %2444 = vmatpush.bf16.msrb.mxu2 %v4313_v40  ;;  %v4666_v40 = vld [vmem:[%s7062_s3 + $0x1c4] sm:$0xf] }
 0x139   :  { %2471 = vmatmul.bf16.vlgmr.msra.gmra.mxu3 %v5761_v18  ;;  %2501 = vmatpush.bf16.msra.mxu1 %v4125_v44  ;;  %v4142_v44 = vld [vmem:[%s7062_s3 + $0x4a0] sm:$0xf0] }
 0x13a   :  { %2558 = vmatpush.bf16.msrb.mxu0 %v3937_v46  ;;  %v3793_v46 = vor.u32 %v4666_v40, %v3790_v41  ;;  %v4145_v47 = vor.u32 %v4755_v43, %v4142_v44  ;;  %v4807_v40 = vld [vmem:[%s7063_s4 + $0x28] sm:$0xff]  ;;  %v4148_v41 = vld [vmem:[%s7062_s3 + $0x490] sm:$0xf]  ;;  %v3985_v43 = vor.u32 %v4714_v36, %v3982_v39 }
 0x13b   :  { %v4759_v44 = vld [vmem:[%s7062_s3 + $0x4a4] sm:$0xf0] }
 0x13c   :  { %2445 = vmatpush.bf16.msrb.mxu2 %v4289_v49  ;;  %v4711_v49 = vld [vmem:[%s7062_s3 + $0x324] sm:$0xf0] }
 0x13d   :  { %2502 = vmatpush.bf16.msra.mxu1 %v4101_v54  ;;  %v3957_v52 = vor.u32 %v4711_v49, %v3956_v58  ;;  %v3769_v54 = vor.u32 %v4660_v51, %v3766_v35  ;;  %v4708_v58 = vld [vmem:[%s7062_s3 + $0x314] sm:$0xf]  ;;  %v3958_v49 = vld [vmem:[%s7062_s3 + $0x328] sm:$0xf0]  ;;  %v4806_v35 = vld [vmem:[%s7063_s4 + $0x20] sm:$0xff] }
 0x13e   :  { %2559 = vmatpush.bf16.msrb.mxu0 %v3913_v59  ;;  %v4801_v59 = vld [vmem:[%s7062_s3 + $0x5f4] sm:$0xf0]  ;;  %v3961_v51 = vor.u32 %v4708_v58, %v3958_v49  ;;  %v4811_v49 = vld [vmem:[%s7063_s4 + $0x48] sm:$0xff] }
 0x13f   :  { %v4317_v61 = vor.u32 %v4801_v59, %v4316_v55  ;;  %v4318_v55 = vld [vmem:[%s7062_s3 + $0x5f8] sm:$0xf0] }
 0x140   :  { %2446 = vmatpush.bf16.msrb.mxu2 %v4265_v63  ;;  %v4129_v63 = vor.u32 %v4750_v60, %v4126_v62  ;;  %v4805_v60 = vld [vmem:[%s7063_s4 + $0x18] sm:$0xff]  ;;  %v4792_v62 = vld [vmem:[%s7062_s3 + $0x5b4] sm:$0xf] }
 0x141   :  { %2503 = vmatpush.bf16.msra.mxu1 %v4077_v50  ;;  %v4744_v50 = vld [vmem:[%s7062_s3 + $0x434] sm:$0xf] }
 0x142   :  { %2560 = vmatpush.bf16.msrb.mxu0 %v3889_v1  ;;  %v4102_v1 = vld [vmem:[%s7062_s3 + $0x448] sm:$0xf0] }
 0x143   :  { %v4105_v5 = vor.u32 %v4744_v50, %v4102_v1  ;;  %v4786_v50 = vld [vmem:[%s7062_s3 + $0x584] sm:$0xf]  ;;  %v4270_v1 = vld [vmem:[%s7062_s3 + $0x598] sm:$0xf0] }
 0x144   :  { %2447 = vmatpush.bf16.msrb.mxu2 %v4241_v7  ;;  %v4738_v7 = vld [vmem:[%s7062_s3 + $0x404] sm:$0xf] }
 0x145   :  { %2504 = vmatpush.bf16.msra.mxu1 %v4053_v9  ;;  %v4783_v9 = vld [vmem:[%s7062_s3 + $0x564] sm:$0xf0]  ;;  %v4081_v4 = vor.u32 %v4738_v7, %v4078_v10  ;;  %v4246_v7 = vld [vmem:[%s7062_s3 + $0x568] sm:$0xf0] }
 0x146   :  { %2561 = vmatpush.bf16.msrb.mxu0 %v3865_v3  ;;  %v4245_v3 = vor.u32 %v4783_v9, %v4244_v19 }
 0x147   :  { %2305 = vmatmul.bf16.gmra.mxu2 %v6427_v42  ;;  %2362 = vmatmul.bf16.gmra.mxu1 %v6221_v27 }
 0x148   :  { %2419 = vmatmul.bf16.gmra.mxu0 %v6013_v56  ;;  %2448 = vmatpush.bf16.msrb.mxu2 %v4217_v14 }
 0x149   :  { %2476 = vmatmul.bf16.gmra.mxu3 %v5843_v11  ;;  %2505 = vmatpush.bf16.msra.mxu1 %v4029_v21  ;;  %v6744_v21 = vpop.f32.mrf.mxu3 }
 0x14a   :  { %2562 = vmatpush.bf16.msrb.mxu0 %v3841_v22  ;;  %v4221_v22 = vor.u32 %v4777_v16, %v4220_v15  ;;  %v4768_v15 = vld [vmem:[%s7062_s3 + $0x4f4] sm:$0xf]  ;;  %v4198_v16 = vld [vmem:[%s7062_s3 + $0x508] sm:$0xf0] }
 0x14b   :  { %v4201_v17 = vor.u32 %v4768_v15, %v4198_v16 }
 0x14c   :  { %2449 = vmatpush.bf16.msrb.mxu2 %v4193_v48  ;;  %v4809_v48 = vld [vmem:[%s7063_s4 + $0x38] sm:$0xff] }
 0x14d   :  { %2506 = vmatpush.bf16.msra.mxu1 %v4005_v30  ;;  %v4720_v30 = vld [vmem:[%s7062_s3 + $0x374] sm:$0xf]  ;;  %3039 = vmatpush.bf16.msra.mxu3 %v4809_v48  ;;  %v4174_v48 = vld [vmem:[%s7062_s3 + $0x4d8] sm:$0xf0] }
 0x14e   :  { %2563 = vmatpush.bf16.msrb.mxu0 %v3817_v32  ;;  %v4009_v32 = vor.u32 %v4720_v30, %v4006_v31  ;;  %v4756_v30 = vld [vmem:[%s7062_s3 + $0x494] sm:$0xf]  ;;  %v4150_v31 = vld [vmem:[%s7062_s3 + $0x4a8] sm:$0xf0] }
 0x150   :  { %2450 = vmatpush.bf16.msrb.mxu2 %v4169_v37 }
 0x151   :  { %2507 = vmatpush.bf16.msra.mxu1 %v3981_v25  ;;  %3040 = vmatpush.bf16.msra.mxu3 %v4808_v33 }
 0x152   :  { %2564 = vmatpush.bf16.msrb.mxu0 %v3793_v46  ;;  %v6794_v46 = vpop.f32.mrf.mxu3 }
 0x154   :  { %2451 = vmatpush.bf16.msrb.mxu2 %v4145_v47  ;;  %v6733_v14 = vpop.f32.mrf.mxu0  ;;  %v4149_v47 = vor.u32 %v4759_v44, %v4148_v41 }
 0x155   :  { %2508 = vmatpush.bf16.msra.mxu1 %v3957_v52  ;;  %3041 = vmatpush.bf16.msra.mxu3 %v4807_v40  ;;  %v2188_v41 = vadd.f32 %v6733_v14, %v6744_v21 }
 0x156   :  { %2565 = vmatpush.bf16.msrb.mxu0 %v3769_v54  ;;  %v4798_v54 = vld [vmem:[%s7062_s3 + $0x5e4] sm:$0xf] }
 0x157   :  { %2376 = vmatmul.bf16.vlgmr.msra.gmra.mxu2 %v6324_v38  ;;  %2433 = vmatmul.bf16.vlgmr.msrb.gmra.mxu1 %v6115_v20  ;;  %v4321_v59 = vor.u32 %v4798_v54, %v4318_v55 }
 0x158   :  { %2490 = vmatmul.bf16.vlgmr.msra.gmra.mxu0 %v5908_v2  ;;  %2520 = vmatpush.bf16.msra.mxu2 %v4317_v61 }
 0x159   :  { %2547 = vmatmul.bf16.vlgmr.msrb.gmra.mxu3 %v5761_v18  ;;  %2577 = vmatpush.bf16.msrb.mxu1 %v4129_v63  ;;  %v4789_v18 = vld [vmem:[%s7062_s3 + $0x594] sm:$0xf0]  ;;  %v4294_v63 = vld [vmem:[%s7062_s3 + $0x5c8] sm:$0xf0] }
 0x15a   :  { %v4269_v8 = vor.u32 %v4789_v18, %v4268_v6  ;;  %3042 = vmatpush.bf16.msra.mxu3 %v4806_v35  ;;  %v6827_v45 = vpop.f32.mrf.mxu3  ;;  %v4297_v53 = vor.u32 %v4792_v62, %v4294_v63  ;;  %v4803_v6 = vld [vmem:[%s7063_s4 + $0x8] sm:$0xff]  ;;  %v4780_v18 = vld [vmem:[%s7062_s3 + $0x554] sm:$0xf] }
 0x15c   :  { %2521 = vmatpush.bf16.msra.mxu2 %v4293_v0  ;;  %v6789_v25 = vpop.f32.mrf.mxu0  ;;  %v4804_v0 = vld [vmem:[%s7063_s4 + $0x10] sm:$0xff] }
 0x15d   :  { %2578 = vmatpush.bf16.msrb.mxu1 %v4105_v5  ;;  %v4273_v5 = vor.u32 %v4786_v50, %v4270_v1 }
 0x15e   :  { %3043 = vmatpush.bf16.msra.mxu3 %v4805_v60 }
 0x160   :  { %2522 = vmatpush.bf16.msra.mxu2 %v4269_v8  ;;  %v4249_v8 = vor.u32 %v4780_v18, %v4246_v7 }
 0x161   :  { %2579 = vmatpush.bf16.msrb.mxu1 %v4081_v4  ;;  %v4802_v4 = vld [vmem:[%s7063_s4] sm:$0xff] }
 0x162   :  { %3044 = vmatpush.bf16.msra.mxu3 %v4804_v0  ;;  %v6853_v9 = vpop.f32.mrf.mxu3 }
 0x164   :  { %2523 = vmatpush.bf16.msra.mxu2 %v4245_v3  ;;  %v6819_v61 = vpop.f32.mrf.mxu0  ;;  %v4774_v3 = vld [vmem:[%s7062_s3 + $0x524] sm:$0xf] }
 0x165   :  { %2580 = vmatpush.bf16.msrb.mxu1 %v4057_v13  ;;  %v4225_v12 = vor.u32 %v4774_v3, %v4222_v57  ;;  %v4817_v13 = vld [vmem:[%s7063_s4 + $0x78] sm:$0xff]  ;;  %v2193_v63 = vadd.f32 %v6819_v61, %v6827_v45 }
 0x166   :  { %3045 = vmatpush.bf16.msra.mxu3 %v4803_v6  ;;  %3058 = vmatpush.bf16.msra.mxu0 %v4817_v13  ;;  %v4823_v6 = vld [vmem:[%s7063_s4 + $0xa8] sm:$0xff]  ;;  %v4821_v3 = vld [vmem:[%s7063_s4 + $0x98] sm:$0xff]  ;;  %v4820_v13 = vld [vmem:[%s7063_s4 + $0x90] sm:$0xff] }
 0x167   :  { %2381 = vmatmul.bf16.gmra.mxu2 %v6427_v42  ;;  %2438 = vmatmul.bf16.gmra.mxu1 %v6221_v27 }
 0x168   :  { %2495 = vmatmul.bf16.gmra.mxu0 %v6013_v56  ;;  %2524 = vmatpush.bf16.msra.mxu2 %v4221_v22 }
 0x169   :  { %2552 = vmatmul.bf16.gmra.mxu3 %v5843_v11  ;;  %2581 = vmatpush.bf16.msrb.mxu1 %v4033_v24  ;;  %v4172_v11 = vld [vmem:[%s7062_s3 + $0x4c0] sm:$0xf]  ;;  %v4762_v24 = vld [vmem:[%s7062_s3 + $0x4c4] sm:$0xf] }
 0x16a   :  { %v4173_v37 = vor.u32 %v4765_v34, %v4172_v11  ;;  %3046 = vmatpush.bf16.msra.mxu3 %v4802_v4  ;;  %v6887_v26 = vpop.f32.mrf.mxu3  ;;  %v4177_v28 = vor.u32 %v4762_v24, %v4174_v48  ;;  %v4814_v11 = vld [vmem:[%s7063_s4 + $0x60] sm:$0xff]  ;;  %v4819_v24 = vld [vmem:[%s7063_s4 + $0x88] sm:$0xff] }
 0x16c   :  { %2525 = vmatpush.bf16.msra.mxu2 %v4197_v29  ;;  %v6849_v10 = vpop.f32.mrf.mxu0  ;;  %v4815_v29 = vld [vmem:[%s7063_s4 + $0x68] sm:$0xff] }
 0x16d   :  { %2582 = vmatpush.bf16.msrb.mxu1 %v4009_v32  ;;  %v4153_v32 = vor.u32 %v4756_v30, %v4150_v31  ;;  %v4818_v30 = vld [vmem:[%s7063_s4 + $0x80] sm:$0xff] }
 0x170   :  { %2526 = vmatpush.bf16.msra.mxu2 %v4173_v37  ;;  %v4813_v37 = vld [vmem:[%s7063_s4 + $0x58] sm:$0xff] }
 0x171   :  { %2583 = vmatpush.bf16.msrb.mxu1 %v3985_v43  ;;  %v4812_v43 = vld [vmem:[%s7063_s4 + $0x50] sm:$0xff] }
 0x172   :  { %v2246_v36 = vpop.f32.mrf.mxu3 }
 0x174   :  { %v6802_v52 = vpop.f32.mrf.mxu1  ;;  %2527 = vmatpush.bf16.msra.mxu2 %v4149_v47  ;;  %v6879_v23 = vpop.f32.mrf.mxu0 }
 0x175   :  { %2584 = vmatpush.bf16.msrb.mxu1 %v3961_v51  ;;  %v2207_v44 = vadd.f32 %v6802_v52, %v2188_v41  ;;  %v4810_v52 = vld [vmem:[%s7063_s4 + $0x40] sm:$0xff] }
 0x177   :  { %2452 = vmatmul.bf16.vlgmr.msrb.gmra.mxu2 %v6324_v38  ;;  %2509 = vmatmul.bf16.vlgmr.msra.gmra.mxu1 %v6115_v20 }
 0x178   :  { %2566 = vmatmul.bf16.vlgmr.msrb.gmra.mxu0 %v5908_v2  ;;  %2596 = vmatpush.bf16.msrb.mxu2 %v4321_v59  ;;  %v4825_v59 = vld [vmem:[%s7063_s4 + $0xb8] sm:$0xff] }
 0x179   :  { %3077 = vmatpush.bf16.msra.mxu1 %v4825_v59 }
 0x17a   :  { %v6922_v21 = vpop.f32.mrf.mxu3 }
 0x17c   :  { %v6829_v2 = vpop.f32.mrf.mxu1  ;;  %2597 = vmatpush.bf16.msrb.mxu2 %v4297_v53  ;;  %v2265_v34 = vpop.f32.mrf.mxu0 }
 0x17d   :  { %v2266_v15 = vadd.f32 %v2265_v34, %v2246_v36 }
 0x180   :  { %2598 = vmatpush.bf16.msrb.mxu2 %v4273_v5 }
 0x182   :  { %v2251_v53 = vpop.f32.mrf.mxu3 }
 0x184   :  { %v6851_v19 = vpop.f32.mrf.mxu1  ;;  %2599 = vmatpush.bf16.msrb.mxu2 %v4249_v8  ;;  %v6920_v51 = vpop.f32.mrf.mxu0  ;;  %v4822_v8 = vld [vmem:[%s7063_s4 + $0xa0] sm:$0xff] }
 0x185   :  { %v2212_v50 = vadd.f32 %v6851_v19, %v2193_v63 }
 0x187   :  { %2457 = vmatmul.bf16.gmra.mxu2 %v6427_v42  ;;  %2514 = vmatmul.bf16.gmra.mxu1 %v6221_v27 }
 0x188   :  { %2571 = vmatmul.bf16.gmra.mxu0 %v6013_v56  ;;  %2600 = vmatpush.bf16.msrb.mxu2 %v4225_v12  ;;  %v4816_v56 = vld [vmem:[%s7063_s4 + $0x70] sm:$0xff]  ;;  %v2264_v12 = vadd.f32 %v6879_v23, %v6887_v26 }
 0x189   :  { %3059 = vmatpush.bf16.msra.mxu0 %v4816_v56 }
 0x18c   :  { %v2213_v22 = vpop.f32.mrf.mxu1  ;;  %2601 = vmatpush.bf16.msrb.mxu2 %v4201_v17  ;;  %v2270_v62 = vpop.f32.mrf.mxu0 }
 0x18d   :  { %3060 = vmatpush.bf16.msra.mxu0 %v4815_v29 }
 0x190   :  { %2602 = vmatpush.bf16.msrb.mxu2 %v4177_v28 }
 0x191   :  { %3061 = vmatpush.bf16.msra.mxu0 %v4814_v11 }
 0x194   :  { %v6898_v33 = vpop.f32.mrf.mxu1  ;;  %2603 = vmatpush.bf16.msrb.mxu2 %v4153_v32  ;;  %v4833_v32 = vld [vmem:[%s7063_s4 + $0xf8] sm:$0xff] }
 0x195   :  { %3062 = vmatpush.bf16.msra.mxu0 %v4813_v37  ;;  %v2339_v4 = vpop.f32.mrf.mxu0  ;;  %v2269_v37 = vadd.f32 %v6920_v51, %v6922_v21  ;;  %v4830_v21 = vld [vmem:[%s7063_s4 + $0xe0] sm:$0xff] }
 0x197   :  { %2528 = vmatmul.bf16.vlgmr.msra.gmra.mxu2 %v6324_v38  ;;  %2585 = vmatmul.bf16.vlgmr.msrb.gmra.mxu1 %v6115_v20  ;;  %v2190_v20 = vadd.f32 %v6789_v25, %v6794_v46 }
 0x198   :  { %3096 = vmatpush.bf16.msra.mxu2 %v4833_v32 }
 0x199   :  { %3063 = vmatpush.bf16.msra.mxu0 %v4812_v43  ;;  %v2209_v47 = vadd.f32 %v6829_v2, %v2190_v20  ;;  %v4824_v2 = vld [vmem:[%s7063_s4 + $0xb0] sm:$0xff]  ;;  %v4831_v20 = vld [vmem:[%s7063_s4 + $0xe8] sm:$0xff] }
 0x19a   :  { %v2225_v39 = vpop.f32.mrf.mxu2  ;;  %3078 = vmatpush.bf16.msra.mxu1 %v4824_v2 }
 0x19b   :  { %v2226_v58 = vadd.f32 %v2225_v39, %v2207_v44  ;;  %v4832_v39 = vld [vmem:[%s7063_s4 + $0xf0] sm:$0xff] }
 0x19c   :  { %v2284_v40 = vpop.f32.mrf.mxu1  ;;  %3097 = vmatpush.bf16.msra.mxu2 %v4832_v39 }
 0x19d   :  { %3064 = vmatpush.bf16.msra.mxu0 %v4811_v49  ;;  %v2615_v25 = vmax.f32 %v2226_v58, 0.0  ;;  %v2341_v16 = vpop.f32.mrf.mxu0 }
 0x19e   :  { %3079 = vmatpush.bf16.msra.mxu1 %v4823_v6 }
 0x1a0   :  { %3098 = vmatpush.bf16.msra.mxu2 %v4831_v20 }
 0x1a1   :  { %3065 = vmatpush.bf16.msra.mxu0 %v4810_v52 }
 0x1a2   :  { %v2227_v14 = vpop.f32.mrf.mxu2  ;;  %3080 = vmatpush.bf16.msra.mxu1 %v4822_v8  ;;  %v4841_v8 = vld [vmem:[%s7063_s4 + $0x138] sm:$0xff] }
 0x1a3   :  { %v2228_v35 = vadd.f32 %v2227_v14, %v2209_v47  ;;  %3115 = vmatpush.bf16.msrb.mxu3 %v4841_v8  ;;  %v4844_v8 = vld [vmem:[%s7063_s4 + $0x150] sm:$0xff] }
 0x1a4   :  { %v6924_v54 = vpop.f32.mrf.mxu1  ;;  %3099 = vmatpush.bf16.msra.mxu2 %v4830_v21 }
 0x1a5   :  { %v2621_v46 = vmax.f32 %v2228_v35, 0.0 }
 0x1a6   :  { %3081 = vmatpush.bf16.msra.mxu1 %v4821_v3 }
 0x1a7   :  { %v2639_v55 = vpack.c.bf16 %v2621_v46, %v2615_v25  ;;  %2533 = vmatmul.bf16.gmra.mxu2 %v6427_v42  ;;  %2590 = vmatmul.bf16.gmra.mxu1 %v6221_v27  ;;  %v2195_v27 = vadd.f32 %v6849_v10, %v6853_v9  ;;  %v2320_v10 = vpop.f32.mrf.mxu3  ;;  %v4829_v25 = vld [vmem:[%s7063_s4 + $0xd8] sm:$0xff] }
 0x1a8   :  { %3100 = vmatpush.bf16.msra.mxu2 %v4829_v25  ;;  %v2340_v52 = vadd.f32 %v2339_v4, %v2320_v10 }
 0x1a9   :  { %3047 = vmatmul.bf16.vlgmr.msra.gmra.mxu3 %v2639_v55  ;;  %v2214_v1 = vadd.f32 %v2213_v22, %v2195_v27  ;;  %v2285_v22 = vadd.f32 %v2284_v40, %v2266_v15  ;;  %v2271_v40 = vadd.f32 %v2270_v62, %v2251_v53  ;;  %v4828_v55 = vld [vmem:[%s7063_s4 + $0xd0] sm:$0xff]  ;;  %v4827_v27 = vld [vmem:[%s7063_s4 + $0xc8] sm:$0xff] }
 0x1aa   :  { %v2230_v60 = vpop.f32.mrf.mxu2  ;;  %3082 = vmatpush.bf16.msra.mxu1 %v4820_v13  ;;  %v4839_v15 = vld [vmem:[%s7063_s4 + $0x128] sm:$0xff] }
 0x1ab   :  { %v2231_v5 = vadd.f32 %v2230_v60, %v2212_v50 }
 0x1ac   :  { %v2289_v0 = vpop.f32.mrf.mxu1  ;;  %3101 = vmatpush.bf16.msra.mxu2 %v4828_v55 }
 0x1ad   :  { %v2627_v45 = vmax.f32 %v2231_v5, 0.0  ;;  %v2290_v41 = vadd.f32 %v2289_v0, %v2271_v40  ;;  %v4835_v40 = vld [vmem:[%s7063_s4 + $0x108] sm:$0xff] }
 0x1ae   :  { %3083 = vmatpush.bf16.msra.mxu1 %v4819_v24 }
 0x1af   :  { %v2322_v17 = vpop.f32.mrf.mxu3 }
 0x1b0   :  { %v2342_v60 = vadd.f32 %v2341_v16, %v2322_v17  ;;  %3102 = vmatpush.bf16.msra.mxu2 %v4827_v27 }
 0x1b2   :  { %v2232_v18 = vpop.f32.mrf.mxu2  ;;  %3084 = vmatpush.bf16.msra.mxu1 %v4818_v30 }
 0x1b3   :  { %v2233_v61 = vadd.f32 %v2232_v18, %v2214_v1  ;;  %v4826_v18 = vld [vmem:[%s7063_s4 + $0xc0] sm:$0xff] }
 0x1b4   :  { %v2358_v9 = vpop.f32.mrf.mxu1  ;;  %3103 = vmatpush.bf16.msra.mxu2 %v4826_v18 }
 0x1b5   :  { %v2633_v7 = vmax.f32 %v2233_v61, 0.0  ;;  %v2359_v63 = vadd.f32 %v2358_v9, %v2340_v52  ;;  %v4840_v9 = vld [vmem:[%s7063_s4 + $0x130] sm:$0xff] }
 0x1b6   :  { %3116 = vmatpush.bf16.msrb.mxu3 %v4840_v9 }
 0x1b7   :  { %2604 = vmatmul.bf16.vlgmr.msrb.gmra.mxu2 %v6324_v38  ;;  %v2645_v19 = vpack.c.bf16 %v2633_v7, %v2627_v45  ;;  %v2283_v38 = vadd.f32 %v6898_v33, %v2264_v12  ;;  %v2344_v33 = vpop.f32.mrf.mxu0  ;;  %v2325_v34 = vpop.f32.mrf.mxu3 }
 0x1b9   :  { %3052 = vmatmul.bf16.gmra.mxu3 %v2645_v19  ;;  %v2345_v19 = vadd.f32 %v2344_v33, %v2325_v34  ;;  %v4836_v33 = vld [vmem:[%s7063_s4 + $0x110] sm:$0xff] }
 0x1ba   :  { %v2301_v57 = vpop.f32.mrf.mxu2  ;;  %3117 = vmatpush.bf16.msrb.mxu3 %v4839_v15 }
 0x1bb   :  { %v2302_v56 = vadd.f32 %v2301_v57, %v2283_v38 }
 0x1bc   :  { %v2360_v48 = vpop.f32.mrf.mxu1 }
 0x1bd   :  { %v2616_v23 = vmax.f32 %v2302_v56, 0.0  ;;  %v2361_v2 = vadd.f32 %v2360_v48, %v2342_v60 }
 0x1bf   :  { %v2346_v58 = vpop.f32.mrf.mxu0  ;;  %v2327_v49 = vpop.f32.mrf.mxu3 }
 0x1c0   :  { %v2347_v3 = vadd.f32 %v2346_v58, %v2327_v49 }
 0x1c2   :  { %v2303_v28 = vpop.f32.mrf.mxu2 }
 0x1c3   :  { %v2304_v29 = vadd.f32 %v2303_v28, %v2285_v22  ;;  %v4838_v28 = vld [vmem:[%s7063_s4 + $0x120] sm:$0xff] }
 0x1c4   :  { %v2363_v36 = vpop.f32.mrf.mxu1  ;;  %3118 = vmatpush.bf16.msrb.mxu3 %v4838_v28 }
 0x1c5   :  { %v2622_v26 = vmax.f32 %v2304_v29, 0.0  ;;  %v2364_v57 = vadd.f32 %v2363_v36, %v2345_v19 }
 0x1c7   :  { %v2640_v31 = vpack.c.bf16 %v2622_v26, %v2616_v23  ;;  %2609 = vmatmul.bf16.gmra.mxu2 %v6427_v42  ;;  %v2288_v42 = vadd.f32 %v6924_v54, %v2269_v37  ;;  %v2415_v59 = vpop.f32.mrf.mxu0  ;;  %v2396_v62 = vpop.f32.mrf.mxu3  ;;  %v4837_v23 = vld [vmem:[%s7063_s4 + $0x118] sm:$0xff] }
 0x1c8   :  { %3119 = vmatpush.bf16.msrb.mxu3 %v4837_v23  ;;  %v2416_v32 = vadd.f32 %v2415_v59, %v2396_v62  ;;  %v4847_v62 = vld [vmem:[%s7063_s4 + $0x168] sm:$0xff] }
 0x1c9   :  { %3066 = vmatmul.bf16.vlgmr.msra.gmra.mxu0 %v2640_v31 }
 0x1ca   :  { %v2306_v11 = vpop.f32.mrf.mxu2 }
 0x1cb   :  { %v2307_v43 = vadd.f32 %v2306_v11, %v2288_v42 }
 0x1cc   :  { %v2365_v35 = vpop.f32.mrf.mxu1  ;;  %3120 = vmatpush.bf16.msrb.mxu3 %v4836_v33 }
 0x1cd   :  { %v2628_v51 = vmax.f32 %v2307_v43, 0.0  ;;  %v2366_v12 = vadd.f32 %v2365_v35, %v2347_v3  ;;  %v4843_v3 = vld [vmem:[%s7063_s4 + $0x148] sm:$0xff] }
 0x1cf   :  { %v2417_v45 = vpop.f32.mrf.mxu0  ;;  %v2398_v7 = vpop.f32.mrf.mxu3 }
 0x1d0   :  { %v2418_v34 = vadd.f32 %v2417_v45, %v2398_v7  ;;  %3121 = vmatpush.bf16.msrb.mxu3 %v4835_v40 }
 0x1d2   :  { %v2308_v44 = vpop.f32.mrf.mxu2 }
 0x1d3   :  { %v2309_v47 = vadd.f32 %v2308_v44, %v2290_v41  ;;  %v4834_v44 = vld [vmem:[%s7063_s4 + $0x100] sm:$0xff] }
 0x1d4   :  { %v2434_v53 = vpop.f32.mrf.mxu1  ;;  %3122 = vmatpush.bf16.msrb.mxu3 %v4834_v44 }
 0x1d5   :  { %v2634_v14 = vmax.f32 %v2309_v47, 0.0  ;;  %v2435_v36 = vadd.f32 %v2434_v53, %v2416_v32 }
 0x1d7   :  { %v2646_v54 = vpack.c.bf16 %v2634_v14, %v2628_v51  ;;  %v2420_v38 = vpop.f32.mrf.mxu0  ;;  %v2401_v17 = vpop.f32.mrf.mxu3  ;;  %v4849_v14 = vld [vmem:[%s7063_s4 + $0x178] sm:$0xff] }
 0x1d8   :  { %3134 = vmatpush.bf16.msrb.mxu0 %v4849_v14  ;;  %4850 = vmatpush.bf16.msrb.mxu1 %v4849_v14  ;;  %v2421_v35 = vadd.f32 %v2420_v38, %v2401_v17  ;;  %v4842_v17 = vld [vmem:[%s7063_s4 + $0x140] sm:$0xff] }
 0x1d9   :  { %3071 = vmatmul.bf16.gmra.mxu0 %v2646_v54  ;;  %v4848_v54 = vld [vmem:[%s7063_s4 + $0x170] sm:$0xff] }
 0x1da   :  { %v2377_v46 = vpop.f32.mrf.mxu2 }
 0x1db   :  { %v2378_v0 = vadd.f32 %v2377_v46, %v2359_v63 }
 0x1dc   :  { %v2436_v4 = vpop.f32.mrf.mxu1  ;;  %3135 = vmatpush.bf16.msrb.mxu0 %v4848_v54  ;;  %4851 = vmatpush.bf16.msrb.mxu1 %v4848_v54 }
 0x1dd   :  { %v2617_v5 = vmax.f32 %v2378_v0, 0.0  ;;  %v2437_v37 = vadd.f32 %v2436_v4, %v2418_v34 }
 0x1df   :  { %v2422_v30 = vpop.f32.mrf.mxu0  ;;  %v2403_v31 = vpop.f32.mrf.mxu3 }
 0x1e0   :  { %v2423_v25 = vadd.f32 %v2422_v30, %v2403_v31  ;;  %3136 = vmatpush.bf16.msrb.mxu0 %v4847_v62  ;;  %4852 = vmatpush.bf16.msrb.mxu1 %v4847_v62 }
 0x1e2   :  { %v2379_v50 = vpop.f32.mrf.mxu2 }
 0x1e3   :  { %v2380_v1 = vadd.f32 %v2379_v50, %v2361_v2  ;;  %v4846_v50 = vld [vmem:[%s7063_s4 + $0x160] sm:$0xff] }
 0x1e4   :  { %v2439_v56 = vpop.f32.mrf.mxu1  ;;  %3137 = vmatpush.bf16.msrb.mxu0 %v4846_v50  ;;  %4853 = vmatpush.bf16.msrb.mxu1 %v4846_v50 }
 0x1e5   :  { %v2623_v6 = vmax.f32 %v2380_v1, 0.0  ;;  %v2440_v46 = vadd.f32 %v2439_v56, %v2421_v35 }
 0x1e7   :  { %v2641_v61 = vpack.c.bf16 %v2623_v6, %v2617_v5  ;;  %v2491_v47 = vpop.f32.mrf.mxu0  ;;  %v2472_v58 = vpop.f32.mrf.mxu3  ;;  %v4845_v5 = vld [vmem:[%s7063_s4 + $0x158] sm:$0xff] }
 0x1e8   :  { %3138 = vmatpush.bf16.msrb.mxu0 %v4845_v5  ;;  %4854 = vmatpush.bf16.msrb.mxu1 %v4845_v5  ;;  %v2492_v7 = vadd.f32 %v2491_v47, %v2472_v58 }
 0x1e9   :  { %3085 = vmatmul.bf16.vlgmr.msra.gmra.mxu1 %v2641_v61 }
 0x1ea   :  { %v2382_v10 = vpop.f32.mrf.mxu2 }
 0x1eb   :  { %v2383_v13 = vadd.f32 %v2382_v10, %v2364_v57 }
 0x1ec   :  { %v2441_v11 = vpop.f32.mrf.mxu1  ;;  %3139 = vmatpush.bf16.msrb.mxu0 %v4844_v8  ;;  %4855 = vmatpush.bf16.msrb.mxu1 %v4844_v8 }
 0x1ed   :  { %v2629_v24 = vmax.f32 %v2383_v13, 0.0  ;;  %v2442_v59 = vadd.f32 %v2441_v11, %v2423_v25 }
 0x1ef   :  { %v2493_v52 = vpop.f32.mrf.mxu0  ;;  %v2474_v55 = vpop.f32.mrf.mxu3 }
 0x1f0   :  { %v2494_v4 = vadd.f32 %v2493_v52, %v2474_v55  ;;  %3140 = vmatpush.bf16.msrb.mxu0 %v4843_v3  ;;  %4856 = vmatpush.bf16.msrb.mxu1 %v4843_v3 }
 0x1f2   :  { %v2384_v16 = vpop.f32.mrf.mxu2 }
 0x1f3   :  { %v2385_v22 = vadd.f32 %v2384_v16, %v2366_v12 }
 0x1f4   :  { %v2510_v51 = vpop.f32.mrf.mxu1  ;;  %3141 = vmatpush.bf16.msrb.mxu0 %v4842_v17  ;;  %4857 = vmatpush.bf16.msrb.mxu1 %v4842_v17 }
 0x1f5   :  { %v2635_v48 = vmax.f32 %v2385_v22, 0.0  ;;  %v2511_v10 = vadd.f32 %v2510_v51, %v2492_v7 }
 0x1f7   :  { %v2647_v29 = vpack.c.bf16 %v2635_v48, %v2629_v24  ;;  %v2496_v6 = vpop.f32.mrf.mxu0  ;;  %v2477_v61 = vpop.f32.mrf.mxu3 }
 0x1f8   :  { %v2497_v48 = vadd.f32 %v2496_v6, %v2477_v61 }
 0x1f9   :  { %3090 = vmatmul.bf16.gmra.mxu1 %v2647_v29 }
 0x1fa   :  { %v2453_v26 = vpop.f32.mrf.mxu2 }
 0x1fb   :  { %v2454_v39 = vadd.f32 %v2453_v26, %v2435_v36 }
 0x1fc   :  { %v2512_v63 = vpop.f32.mrf.mxu1 }
 0x1fd   :  { %v2618_v43 = vmax.f32 %v2454_v39, 0.0  ;;  %v2513_v19 = vadd.f32 %v2512_v63, %v2494_v4 }
 0x1ff   :  { %v2498_v13 = vpop.f32.mrf.mxu0  ;;  %v2479_v15 = vpop.f32.mrf.mxu3 }
 0x200   :  { %v2499_v23 = vadd.f32 %v2498_v13, %v2479_v15 }
 0x202   :  { %v2455_v42 = vpop.f32.mrf.mxu2 }
 0x203   :  { %v2456_v41 = vadd.f32 %v2455_v42, %v2437_v37 }
 0x204   :  { %v2515_v45 = vpop.f32.mrf.mxu1 }
 0x205   :  { %v2624_v20 = vmax.f32 %v2456_v41, 0.0  ;;  %v2516_v26 = vadd.f32 %v2515_v45, %v2497_v48 }
 0x207   :  { %v2642_v49 = vpack.c.bf16 %v2624_v20, %v2618_v43  ;;  %v2567_v28 = vpop.f32.mrf.mxu0  ;;  %v2548_v29 = vpop.f32.mrf.mxu3 }
 0x208   :  { %v2568_v43 = vadd.f32 %v2567_v28, %v2548_v29 }
 0x209   :  { %3104 = vmatmul.bf16.vlgmr.msra.gmra.mxu2 %v2642_v49 }
 0x20a   :  { %v2458_v21 = vpop.f32.mrf.mxu2 }
 0x20b   :  { %v2459_v60 = vadd.f32 %v2458_v21, %v2440_v46 }
 0x20c   :  { %v2517_v22 = vpop.f32.mrf.mxu1 }
 0x20d   :  { %v2630_v0 = vmax.f32 %v2459_v60, 0.0  ;;  %v2518_v31 = vadd.f32 %v2517_v22, %v2499_v23 }
 0x20f   :  { %v2569_v39 = vpop.f32.mrf.mxu0  ;;  %v2550_v40 = vpop.f32.mrf.mxu3 }
 0x210   :  { %v2570_v20 = vadd.f32 %v2569_v39, %v2550_v40 }
 0x212   :  { %v2460_v53 = vpop.f32.mrf.mxu2 }
 0x213   :  { %v2461_v2 = vadd.f32 %v2460_v53, %v2442_v59 }
 0x214   :  { %v2586_v30 = vpop.f32.mrf.mxu1 }
 0x215   :  { %v2636_v27 = vmax.f32 %v2461_v2, 0.0  ;;  %v2587_v44 = vadd.f32 %v2586_v30, %v2568_v43 }
 0x217   :  { %v2648_v1 = vpack.c.bf16 %v2636_v27, %v2630_v0  ;;  %v2572_v49 = vpop.f32.mrf.mxu0  ;;  %v2553_v21 = vpop.f32.mrf.mxu3 }
 0x218   :  { %v2573_v59 = vadd.f32 %v2572_v49, %v2553_v21 }
 0x219   :  { %3109 = vmatmul.bf16.gmra.mxu2 %v2648_v1 }
 0x21a   :  { %v2529_v18 = vpop.f32.mrf.mxu2 }
 0x21b   :  { %v2530_v9 = vadd.f32 %v2529_v18, %v2511_v10 }
 0x21c   :  { %v2588_v42 = vpop.f32.mrf.mxu1 }
 0x21d   :  { %v2619_v38 = vmax.f32 %v2530_v9, 0.0  ;;  %v2589_v47 = vadd.f32 %v2588_v42, %v2570_v20  ;;  %v4858_v9 = vld [vmem:[%s7061_s2 + $0x4] ss:$0 sm:$0xff] }
 0x21f   :  { %v2574_v55 = vpop.f32.mrf.mxu0  ;;  %v2555_v60 = vpop.f32.mrf.mxu3 }
 0x220   :  { %v2575_v63 = vadd.f32 %v2574_v55, %v2555_v60 }
 0x222   :  { %v2531_v57 = vpop.f32.mrf.mxu2 }
 0x223   :  { %v2532_v12 = vadd.f32 %v2531_v57, %v2513_v19 }
 0x224   :  { %v2591_v35 = vpop.f32.mrf.mxu1 }
 0x225   :  { %v2625_v16 = vmax.f32 %v2532_v12, 0.0  ;;  %v2592_v53 = vadd.f32 %v2591_v35, %v2573_v59 }
 0x227   :  { %v2643_v56 = vpack.c.bf16 %v2625_v16, %v2619_v38 }
 0x229   :  { %3123 = vmatmul.bf16.vlgmr.msrb.gmra.mxu3 %v2643_v56 }
 0x22a   :  { %v2534_v24 = vpop.f32.mrf.mxu2 }
 0x22b   :  { %v2535_v32 = vadd.f32 %v2534_v24, %v2516_v26 }
 0x22c   :  { %v2593_v62 = vpop.f32.mrf.mxu1  ;;  %v3048_v18 = vpop.f32.mrf.mxu3 }
 0x22d   :  { %v2631_v34 = vmax.f32 %v2535_v32, 0.0  ;;  %v2594_v2 = vadd.f32 %v2593_v62, %v2575_v63  ;;  %v3049_v13 = vadd.f32 %v4858_v9, %v3048_v18 }
 0x232   :  { %v2536_v33 = vpop.f32.mrf.mxu2 }
 0x233   :  { %v2537_v11 = vadd.f32 %v2536_v33, %v2518_v31 }
 0x234   :  { %v3050_v61 = vpop.f32.mrf.mxu3 }
 0x235   :  { %v2637_v36 = vmax.f32 %v2537_v11, 0.0  ;;  %v3051_v24 = vadd.f32 %v4858_v9, %v3050_v61 }
 0x237   :  { %v2649_v37 = vpack.c.bf16 %v2637_v36, %v2631_v34 }
 0x239   :  { %3128 = vmatmul.bf16.gmra.mxu3 %v2649_v37 }
 0x23a   :  { %v2605_v41 = vpop.f32.mrf.mxu2 }
 0x23b   :  { %v2606_v58 = vadd.f32 %v2605_v41, %v2587_v44 }
 0x23c   :  { %v3053_v7 = vpop.f32.mrf.mxu3 }
 0x23d   :  { %v2620_v54 = vmax.f32 %v2606_v58, 0.0  ;;  %v3054_v32 = vadd.f32 %v4858_v9, %v3053_v7 }
 0x242   :  { %v2607_v51 = vpop.f32.mrf.mxu2 }
 0x243   :  { %v2608_v14 = vadd.f32 %v2607_v51, %v2589_v47 }
 0x244   :  { %v3055_v10 = vpop.f32.mrf.mxu3 }
 0x245   :  { %v2626_v25 = vmax.f32 %v2608_v14, 0.0  ;;  %v3056_v43 = vadd.f32 %v4858_v9, %v3055_v10 }
 0x246   :  { %v3067_v45 = vpop.f32.mrf.mxu0 }
 0x247   :  { %v2644_v46 = vpack.c.bf16 %v2626_v25, %v2620_v54  ;;  %v3068_v38 = vadd.f32 %v3067_v45, %v3049_v13 }
 0x249   :  { %3142 = vmatmul.bf16.vlgmr.msrb.gmra.mxu0 %v2644_v46 }
 0x24a   :  { %v2610_v52 = vpop.f32.mrf.mxu2 }
 0x24b   :  { %v2611_v0 = vadd.f32 %v2610_v52, %v2592_v53 }
 0x24d   :  { %v2632_v1 = vmax.f32 %v2611_v0, 0.0 }
 0x24e   :  { %v3069_v8 = vpop.f32.mrf.mxu0 }
 0x24f   :  { %v3070_v23 = vadd.f32 %v3069_v8, %v3051_v24 }
 0x252   :  { %v2612_v27 = vpop.f32.mrf.mxu2 }
 0x253   :  { %v2613_v50 = vadd.f32 %v2612_v27, %v2594_v2 }
 0x255   :  { %v2638_v5 = vmax.f32 %v2613_v50, 0.0 }
 0x256   :  { %v3072_v19 = vpop.f32.mrf.mxu0 }
 0x257   :  { %v2650_v6 = vpack.c.bf16 %v2638_v5, %v2632_v1  ;;  %v3073_v37 = vadd.f32 %v3072_v19, %v3054_v32 }
 0x259   :  { %3147 = vmatmul.bf16.vlgmr.msrb.gmra.mxu1 %v2650_v6 }
 0x25e   :  { %v3074_v15 = vpop.f32.mrf.mxu0 }
 0x25f   :  { %v3075_v47 = vadd.f32 %v3074_v15, %v3056_v43 }
 0x266   :  { %v3086_v4 = vpop.f32.mrf.mxu1 }
 0x267   :  { %v3087_v16 = vadd.f32 %v3086_v4, %v3068_v38 }
 0x26e   :  { %v3088_v3 = vpop.f32.mrf.mxu1 }
 0x26f   :  { %v3089_v30 = vadd.f32 %v3088_v3, %v3070_v23 }
 0x276   :  { %v3091_v17 = vpop.f32.mrf.mxu1 }
 0x277   :  { %v3092_v42 = vadd.f32 %v3091_v17, %v3073_v37 }
 0x27e   :  { %v3093_v33 = vpop.f32.mrf.mxu1 }
 0x27f   :  { %v3094_v51 = vadd.f32 %v3093_v33, %v3075_v47 }
 0x28c   :  { %v3105_v57 = vpop.f32.mrf.mxu2 }
 0x28d   :  { %v3106_v22 = vadd.f32 %v3105_v57, %v3087_v16 }
 0x294   :  { %v3107_v56 = vpop.f32.mrf.mxu2 }
 0x295   :  { %v3108_v31 = vadd.f32 %v3107_v56, %v3089_v30 }
 0x29c   :  { %v3110_v34 = vpop.f32.mrf.mxu2 }
 0x29d   :  { %v3111_v41 = vadd.f32 %v3110_v34, %v3092_v42 }
 0x2a4   :  { %v3112_v49 = vpop.f32.mrf.mxu2 }
 0x2a5   :  { %v3113_v21 = vadd.f32 %v3112_v49, %v3094_v51 }
 0x2ac   :  { %v3124_v12 = vpop.f32.mrf.mxu3 }
 0x2ad   :  { %v3125_v48 = vadd.f32 %v3124_v12, %v3106_v22 }
 0x2b4   :  { %v3126_v28 = vpop.f32.mrf.mxu3 }
 0x2b5   :  { %v3127_v11 = vadd.f32 %v3126_v28, %v3108_v31 }
 0x2bc   :  { %v3129_v40 = vpop.f32.mrf.mxu3 }
 0x2bd   :  { %v3130_v20 = vadd.f32 %v3129_v40, %v3111_v41 }
 0x2c4   :  { %v3131_v14 = vpop.f32.mrf.mxu3 }
 0x2c5   :  { %v3132_v35 = vadd.f32 %v3131_v14, %v3113_v21 }
 0x2c6   :  { %v3143_v29 = vpop.f32.mrf.mxu0 }
 0x2c7   :  { %v3144_v26 = vadd.f32 %v3143_v29, %v3125_v48 }
 0x2c9   :  { %3154 = vst.msk [vmem:[%s7064_s5] sm:$0xff] %vm3153_vm2, %v3144_v26 }
 0x2ce   :  { %v3145_v36 = vpop.f32.mrf.mxu0 }
 0x2cf   :  { %v3146_v39 = vadd.f32 %v3145_v36, %v3127_v11 }
 0x2d1   :  { %3155 = vst.msk [vmem:[%s7064_s5 + $0x8] sm:$0xff] %vm3153_vm2, %v3146_v39 }
 0x2d6   :  { %v3148_v44 = vpop.f32.mrf.mxu1 }
 0x2d7   :  { %v3149_v58 = vadd.f32 %v3148_v44, %v3130_v20 }
 0x2d9   :  { %3156 = vst.msk [vmem:[%s7064_s5 + $0x10] sm:$0xff] %vm3153_vm2, %v3149_v58 }
 0x2de   :  { %v3150_v54 = vpop.f32.mrf.mxu1 }
 0x2df   :  { %v3151_v25 = vadd.f32 %v3150_v54, %v3132_v35 }
 0x2e1   :  { %3157 = vst.msk [vmem:[%s7064_s5 + $0x18] sm:$0xff] %vm3153_vm2, %v3151_v25 }

</bundles_post_ra>
